<compile_context>
chip_gen: v6e
topology: v6e:2x2x1
jax: 0.10.0
libtpu: 0.0.40
codegen_flags: <defaults>
</compile_context>

<pallas_src>
import functools

import jax
import jax.numpy as jnp
from jax.experimental import pallas as pl
from jax.experimental.pallas import tpu as pltpu

PI = 3.141592653589793


def _posmap_kernel(x_ref, o_ref, *, L, scale, use_double_angle):
    # x_ref: (TR, D) in VMEM;  o_ref: (TR, D*(2L+1)) in VMEM
    x = x_ref[...].astype(jnp.float32)

    has_scale = (scale != 1.0)            # compile-time constant
    xs = x * scale if has_scale else x
    inv = (1.0 / scale) if has_scale else 1.0

    # Slab 0 of the output is x*scale/scale == x: write x directly, no
    # redundant mul / rounding round-trip.
    parts = [x]

    if use_double_angle:
        # v7x path: only 2 EUP transcendentals; the other frequencies come
        # from the VPU double-angle recurrence (EUP is the binding slot when
        # HBM is fast enough to expose it).
        s = jnp.sin(PI * xs)
        c = jnp.cos(PI * xs)
        for i in range(L):
            if i > 0:
                s, c = 2.0 * s * c, c * c - s * s
            parts.append(s * inv if has_scale else s)
            parts.append(c * inv if has_scale else c)
    else:
        # Exact path (v5e/v6e are HBM-bound; EUP work hides under the
        # memory wall and numerics match the reference bit-for-bit-ish).
        for i in range(L):
            arg = ((2.0 ** i) * PI) * xs
            s = jnp.sin(arg)
            c = jnp.cos(arg)
            parts.append(s * inv if has_scale else s)
            parts.append(c * inv if has_scale else c)

    # Single lane-dense store of the whole tile (replaces 2L+1 masked
    # width-D column stores at non-128-aligned lane offsets).
    o_ref[...] = jnp.concatenate(parts, axis=-1).astype(o_ref.dtype)


def _choose_tile_rows(rows, d, out_dim, itemsize,
                      budget_bytes=8 << 20, tr_max=2048):
    """Largest row tile (multiple of 8, <= tr_max) whose double-buffered
    in+out blocks fit a conservative VMEM budget (safe on v7x's 64 MiB too)."""
    rows8 = ((rows + 7) // 8) * 8
    per_row = 2 * (d + out_dim) * max(int(itemsize), 4)   # 2x = double buffer
    tr = budget_bytes // per_row
    tr = max(8, min(tr_max, (tr // 8) * 8))
    return min(tr, rows8)


def _use_double_angle_default():
    # Enable the recurrence only where it pays off (v7x); exact sin/cos
    # elsewhere. Fall back to the exact path if detection fails.
    try:
        kind = jax.devices()[0].device_kind.lower()
        return ("v7" in kind) or ("tpu7" in kind)
    except Exception:
        return False


def positional_mapping(x, L=5, scale=1.0, *, use_double_angle=None,
                       tile_rows=None):
    """JAX/Pallas equivalent of PositionalMapping.forward."""
    x = jnp.asarray(x)
    scale = float(scale)
    if L == 0:
        return x * scale          # matches the PyTorch module's early return

    if use_double_angle is None:
        use_double_angle = _use_double_angle_default()

    orig_shape = x.shape
    D = orig_shape[-1]
    rows = 1
    for s in orig_shape[:-1]:
        rows *= s
    out_dim = D * (2 * L + 1)
    x2 = x.reshape(rows, D)

    if tile_rows is None:
        tr = _choose_tile_rows(rows, D, out_dim, jnp.dtype(x.dtype).itemsize)
    else:
        tr = max(8, (int(tile_rows) // 8) * 8)

    # Pad rows to a multiple of the tile so every block is full (remainder
    # handled wrapper-side; padded rows are sliced off below).
    rows_pad = ((rows + tr - 1) // tr) * tr
    if rows_pad != rows:
        x2 = jnp.pad(x2, ((0, rows_pad - rows), (0, 0)))

    kernel = functools.partial(_posmap_kernel, L=L, scale=scale,
                               use_double_angle=bool(use_double_angle))

    out2 = pl.pallas_call(
        kernel,
        out_shape=jax.ShapeDtypeStruct((rows_pad, out_dim), x.dtype),
        grid_spec=pltpu.PrefetchScalarGridSpec(
            num_scalar_prefetch=0,
            grid=(rows_pad // tr,),
            in_specs=[pl.BlockSpec((tr, D), lambda i: (i, 0))],
            out_specs=pl.BlockSpec((tr, out_dim), lambda i: (i, 0)),
        ),
        compiler_params=pltpu.CompilerParams(
            dimension_semantics=("parallel",)),
    )(x2)

    if rows_pad != rows:
        out2 = out2[:rows]
    return out2.reshape(*orig_shape[:-1], out_dim)


def _reference(x, L=5, scale=1.0):
    """Pure-JAX reference mirroring the PyTorch forward."""
    x = x * scale
    if L == 0:
        return x
    h = [x]
    for i in range(L):
        h.append(jnp.sin((2 ** i) * PI * x))
        h.append(jnp.cos((2 ** i) * PI * x))
    return jnp.concatenate(h, axis=-1) / scale


if __name__ == "__main__":
    L = 5

    # Primary test: batch=2, seq=8, input_dim=16 -> output last dim = 176.
    x = jax.random.normal(jax.random.PRNGKey(0), (2, 8, 16), dtype=jnp.float32)
    out = jax.block_until_ready(
        positional_mapping(x, L=L, scale=1.0, use_double_angle=False))
    ref = _reference(x, L=L, scale=1.0)
    assert out.shape == (2, 8, 16 * (2 * L + 1)), out.shape
    assert jnp.allclose(out, ref, atol=1e-5, rtol=1e-5), "mismatch (exact path)"

    # Multi-tile grid + padded remainder + non-unit scale.
    x2 = jax.random.normal(jax.random.PRNGKey(1), (13, 5, 16), dtype=jnp.float32)
    out2 = jax.block_until_ready(
        positional_mapping(x2, L=L, scale=0.5, use_double_angle=False,
                           tile_rows=8))
    ref2 = _reference(x2, L=L, scale=0.5)
    assert out2.shape == (13, 5, 16 * (2 * L + 1)), out2.shape
    assert jnp.allclose(out2, ref2, atol=1e-5, rtol=1e-5), "mismatch (tiled path)"

    # v7x fast path (double-angle recurrence): validated at a slightly looser
    # tolerance since errors accumulate over L doublings.
    out3 = jax.block_until_ready(
        positional_mapping(x, L=L, scale=1.0, use_double_angle=True))
    assert jnp.allclose(out3, ref, atol=1e-4, rtol=1e-4), "mismatch (recurrence)"

    print("KERNEL_OK")
</pallas_src>

<mosaic_0001>
module attributes {stable_mosaic.version = 11 : i64} {
  func.func @_posmap_kernel(%arg0: i32, %arg1: memref<16x16xf32, #tpu.memory_space<vmem>>, %arg2: memref<16x176xf32, #tpu.memory_space<vmem>>) attributes {dimension_semantics = [#tpu.dimension_semantics<parallel>], iteration_bounds = array<i64: 1>, scalar_prefetch = 0 : i64, scratch_operands = 0 : i64, tpu.core_type = #tpu.core_type<tc>, window_params = [{transform_indices = @transform_0, window_bounds = array<i64: 16, 16>}, {transform_indices = @transform_1, window_bounds = array<i64: 16, 176>}]} {
    %c0 = arith.constant 0 : index
    %c0_0 = arith.constant 0 : index
    %0 = vector.load %arg1[%c0, %c0_0] : memref<16x16xf32, #tpu.memory_space<vmem>>, vector<16x16xf32>
    %cst = arith.constant 3.14159274 : f32
    %1 = vector.broadcast %cst : f32 to vector<16x16xf32>
    %2 = arith.mulf %1, %0 : vector<16x16xf32>
    %3 = math.sin %2 : vector<16x16xf32>
    %4 = math.cos %2 : vector<16x16xf32>
    %cst_1 = arith.constant 6.28318548 : f32
    %5 = vector.broadcast %cst_1 : f32 to vector<16x16xf32>
    %6 = arith.mulf %5, %0 : vector<16x16xf32>
    %7 = math.sin %6 : vector<16x16xf32>
    %8 = math.cos %6 : vector<16x16xf32>
    %cst_2 = arith.constant 12.566371 : f32
    %9 = vector.broadcast %cst_2 : f32 to vector<16x16xf32>
    %10 = arith.mulf %9, %0 : vector<16x16xf32>
    %11 = math.sin %10 : vector<16x16xf32>
    %12 = math.cos %10 : vector<16x16xf32>
    %cst_3 = arith.constant 25.1327419 : f32
    %13 = vector.broadcast %cst_3 : f32 to vector<16x16xf32>
    %14 = arith.mulf %13, %0 : vector<16x16xf32>
    %15 = math.sin %14 : vector<16x16xf32>
    %16 = math.cos %14 : vector<16x16xf32>
    %cst_4 = arith.constant 50.2654839 : f32
    %17 = vector.broadcast %cst_4 : f32 to vector<16x16xf32>
    %18 = arith.mulf %17, %0 : vector<16x16xf32>
    %19 = math.sin %18 : vector<16x16xf32>
    %20 = math.cos %18 : vector<16x16xf32>
    %21 = tpu.concatenate %0, %3, %4, %7, %8, %11, %12, %15, %16, %19, %20 in 1 : vector<16x16xf32>, vector<16x16xf32>, vector<16x16xf32>, vector<16x16xf32>, vector<16x16xf32>, vector<16x16xf32>, vector<16x16xf32>, vector<16x16xf32>, vector<16x16xf32>, vector<16x16xf32>, vector<16x16xf32> -> vector<16x176xf32>
    %c0_5 = arith.constant 0 : index
    %c0_6 = arith.constant 0 : index
    %22 = vector.load %arg2[%c0_5, %c0_6] : memref<16x176xf32, #tpu.memory_space<vmem>>, vector<16x176xf32>
    tpu.vector_store %arg2[%c0_5, %c0_6], %21 {strides = array<i32>} : memref<16x176xf32, #tpu.memory_space<vmem>>, vector<16x176xf32>,
    return
  }
  func.func @transform_0(%arg0: i32) -> (i32, i32) {
    %c0_i32 = arith.constant 0 : i32
    %c0_i32_0 = arith.constant 0 : i32
    return %arg0, %c0_i32 : i32, i32
  }
  func.func @transform_1(%arg0: i32) -> (i32, i32) {
    %c0_i32 = arith.constant 0 : i32
    %c0_i32_0 = arith.constant 0 : i32
    return %arg0, %c0_i32 : i32, i32
  }
}

</mosaic_0001>

<bundles_post_ra>
// kernel: tpu_custom_call.1
= control target key start
LH: loop header
LB: loop body
LE: loop exit
PB: predicated region body
PF: predicated region fallthrough
CT: control target
= control target key end

     0   :  { %6 = vsyncpa [#allocation3], 0  ;;  %s3446_s0 = inlined_call_operand.hbm [shape: f32[16,16], index: 0, kind: input, shape index: {}]   ;;  %s3447_s1 = inlined_call_operand.hbm [shape: f32[16,176], index: 1, kind: output, shape index: {}]  }
   0x1   :  { %7 = vsyncpa [#allocation4], 0  ;;  %s2449_s6 = smov [#allocation2]  }
   0x2   :  { %s13_s7 = sshll.u32 %s2449_s6, 4  ;;  %s14_s7 = int_to_ptr.vmem [resolvable:$true] %s13_s7 }
   0x3   :  { %s2413_s8 = scalar_lea.vmem %s14_s7, 256  ;;  %p2418_p1 = scmp.lt.s32.totalorder %s14_s7, %s14_s7 }
   0x4   :  { %p2414_p0 = scmp.ne.s32.totalorder %s14_s7, %s2413_s8  ;;  %p2419_p2 = scmp.lt.s32.totalorder %s2413_s8, %s2413_s8 }
   0x6   :  { %p2420_p3 = por %p2419_p2, %p2418_p1 }
   0x8   :  { %p2421_p4 = pnand %p2420_p3, %p2414_p0 }
   0xa   :  { %2424 = shalt.err (!%p2421_p4)
}
   0xb   :  { %s2450_s9 = smov 128   ;;  %s2451_s10 = smov 8  }
   0xc   :  { %19 = dma.hbm_to_vmem [thread:$0]  %s3446_s0, 256, %s14_s7, [#allocation3], %s2450_s9, %s2450_s9, %s2451_s10  }
   0xd   :  { %2445 = dma.done.wait [#allocation3], 256  }
   0xe   :  { %2446 = vsyncadd [#allocation3], 4294967040  ;;  %v2480_v0 = vld [vmem:[#allocation2] sm:$0xff]  ;;  %v2482_v1 = vld [vmem:[#allocation2 + $0x8] sm:$0xff]  ;;  %v2452_v33 = vmov 683565275  }
   0xf   :  { %v2485_v2 = vmul.f32 3.1415927, %v2480_v0  ;;  %v2488_v3 = vmul.f32 3.1415927, %v2482_v1  ;;  %v2491_v4 = vmul.f32 6.2831855, %v2482_v1 }
  0x10   :  { %v2503_v23 = vmul.f32 6.2831855, %v2480_v0  ;;  %v2453_v35 = vmov 2475754826   ;;  %v2454_v37 = vmov 2131351028  }
  0x11   :  { %v27_v5 = vand.u32 2147483647, %v2485_v2  ;;  %v30_v6 = vand.u32 2139095040, %v2485_v2  ;;  %v131_v7 = vand.u32 2147483647, %v2488_v3  ;;  %v134_v8 = vand.u32 2139095040, %v2488_v3 }
  0x12   :  { %v550_v13 = vand.u32 2139095040, %v2491_v4  ;;  %v547_v27 = vand.u32 2147483647, %v2491_v4  ;;  %v2455_v39 = vmov 2102212464   ;;  %vm29_vm13 = vcmp.lt.s32.totalorder %v2485_v2, 0 }
  0x13   :  { %v31_v9 = vshrl.u32 %v30_v6, 23  ;;  %v34_v10 = vand.u32 8388607, %v27_v5  ;;  %v135_v11 = vshrl.u32 %v134_v8, 23  ;;  %v138_v12 = vand.u32 8388607, %v131_v7 }
  0x14   :  { %v551_v16 = vshrl.u32 %v550_v13, 23  ;;  %v2456_v41 = vmov 920167782   ;;  %v2457_v49 = vmov 1326507024   ;;  %s2458_s0 = smov 32  }
  0x15   :  { %v2223_v14 = vadd.s32 4294967169, %v31_v9  ;;  %v2227_v15 = vadd.s32 4294967169, %v135_v11  ;;  %v35_v18 = vor.u32 8388608, %v34_v10  ;;  %v139_v19 = vor.u32 8388608, %v138_v12  ;;  %s2459_s13 = smov 16   ;;  %s2460_s14 = smov 48  }
  0x16   :  { %v2243_v21 = vadd.s32 4294967169, %v551_v16  ;;  %vm2602_vm14 = vcmp.le.f32.partialorder %v27_v5, 0.7853982  ;;  %s2461_s15 = smov 64   ;;  %s2462_s16 = smov 80  }
  0x17   :  { %v37_v17 = vadd.s32 1, %v2223_v14  ;;  %v141_v20 = vadd.s32 1, %v2227_v15  ;;  %v2506_v28 = vshll.u32 %v35_v18, 8  ;;  %v2508_v30 = vshll.u32 %v139_v19, 8  ;;  %s2463_s17 = smov 96   ;;  %s2464_s18 = smov 112  }
  0x18   :  { %v2510_v31 = vadd.s32 1, %v2243_v21  ;;  %s2465_s19 = smov [#allocation5]  }
  0x19   :  { %vm38_vm0 = vcmp.gt.s32.totalorder %v37_v17, 0  ;;  %vm142_vm1 = vcmp.gt.s32.totalorder %v141_v20, 0  ;;  %s2211_s20 = sshll.u32 %s2465_s19, 4  ;;  %s2212_s20 = int_to_ptr.vmem [resolvable:$true] %s2211_s20 }
  0x1a   :  { %v39_v22 = vsel %vm38_vm0, %v37_v17, 0  ;;  %v143_v26 = vsel %vm142_vm1, %v141_v20, 0  ;;  %vm558_vm6 = vcmp.gt.s32.totalorder %v2510_v31, 0  ;;  %s2425_s21 = scalar_lea.vmem %s2212_s20, 512  ;;  %p2430_p6 = scmp.lt.s32.totalorder %s2212_s20, %s2212_s20 }
  0x1b   :  { %v40_v24 = vshrl.u32 %v39_v22, 5  ;;  %v41_v25 = vand.u32 31, %v39_v22  ;;  %v145_v29 = vand.u32 31, %v143_v26  ;;  %v2517_v43 = vshrl.u32 %v143_v26, 5  ;;  %p2426_p5 = scmp.ne.s32.totalorder %s2212_s20, %s2425_s21  ;;  %p2431_p7 = scmp.lt.s32.totalorder %s2425_s21, %s2425_s21 }
  0x1d   :  { %v42_v32 = vsub.s32 32, %v41_v25  ;;  %v44_v34 = vshll.u32 %v2452_v33, %v41_v25  ;;  %v47_v36 = vshll.u32 %v2453_v35, %v41_v25  ;;  %v50_v38 = vshll.u32 %v2454_v37, %v41_v25  ;;  %p2432_p8 = por %p2431_p7, %p2430_p6 }
  0x1e   :  { %v53_v40 = vshll.u32 %v2455_v39, %v41_v25  ;;  %v56_v42 = vshll.u32 %v2456_v41, %v41_v25  ;;  %vm59_vm2 = vcmp.lt.s32.totalorder %v40_v24, 1  ;;  %vm60_vm3 = vcmp.lt.s32.totalorder %v40_v24, 2 }
  0x1f   :  { %v43_v44 = vshrl.u32 %v2452_v33, %v42_v32  ;;  %v45_v45 = vshrl.u32 %v2453_v35, %v42_v32  ;;  %v48_v46 = vshrl.u32 %v2454_v37, %v42_v32  ;;  %v51_v47 = vshrl.u32 %v2455_v39, %v42_v32  ;;  %p2433_p9 = pnand %p2432_p8, %p2426_p5 }
  0x20   :  { %v54_v48 = vshrl.u32 %v2456_v41, %v42_v32  ;;  %v57_v50 = vshrl.u32 %v2457_v49, %v42_v32  ;;  %vm62_vm4 = vcmp.lt.s32.totalorder %v40_v24, 4  ;;  %v146_v54 = vsub.s32 32, %v145_v29 }
  0x21   :  { %v46_v51 = vor.u32 %v45_v45, %v44_v34  ;;  %v49_v52 = vor.u32 %v48_v46, %v47_v36  ;;  %v52_v53 = vor.u32 %v51_v47, %v50_v38  ;;  %vm61_vm5 = vcmp.lt.s32.totalorder %v40_v24, 3 }
  0x22   :  { %v55_v55 = vor.u32 %v54_v48, %v53_v40  ;;  %v58_v56 = vor.u32 %v57_v50, %v56_v42  ;;  %v148_v57 = vshll.u32 %v2452_v33, %v145_v29  ;;  %v151_v8 = vshll.u32 %v2453_v35, %v145_v29 }
  0x23   :  { %v63_v58 = vsel %vm59_vm2, %v43_v44, %v46_v51  ;;  %v64_v59 = vsel %vm62_vm4, %v52_v53, 2102212464  ;;  %v67_v60 = vsel %vm59_vm2, %v46_v51, %v49_v52  ;;  %v71_v61 = vsel %vm59_vm2, %v49_v52, %v52_v53 }
  0x24   :  { %v65_v62 = vsel %vm61_vm5, %v49_v52, %v64_v59  ;;  %v68_v63 = vsel %vm62_vm4, %v55_v55, 920167782  ;;  %v72_v6 = vsel %vm62_vm4, %v58_v56, 1326507024  ;;  %v147_v11 = vshrl.u32 %v2452_v33, %v146_v54 }
  0x25   :  { %v69_v9 = vsel %vm61_vm5, %v52_v53, %v68_v63  ;;  %v73_v10 = vsel %vm61_vm5, %v55_v55, %v72_v6  ;;  %v149_v12 = vshrl.u32 %v2453_v35, %v146_v54  ;;  %v66_v13 = vsel %vm60_vm3, %v63_v58, %v65_v62 }
  0x26   :  { %v70_v14 = vsel %vm60_vm3, %v67_v60, %v69_v9  ;;  %v74_v15 = vsel %vm60_vm3, %v71_v61, %v73_v10  ;;  %v152_v16 = vshrl.u32 %v2454_v37, %v146_v54  ;;  %v154_v25 = vshll.u32 %v2454_v37, %v145_v29 }
  0x27   :  { %v2538_v17 = vmul.u32.u64.low %v2506_v28, %v74_v15  ;;  %v2539_v18 = vmul.u32.u64.high %v2506_v28, %v74_v15, %v2538_v17  ;;  %v2542_v19 = vmul.u32.u64.low %v2506_v28, %v70_v14  ;;  %v2543_v20 = vmul.u32.u64.high %v2506_v28, %v70_v14, %v2542_v19 }
  0x28   :  { %v150_v21 = vor.u32 %v149_v12, %v148_v57  ;;  %v153_v22 = vor.u32 %v152_v16, %v151_v8  ;;  %v155_v26 = vshrl.u32 %v2455_v39, %v146_v54  ;;  %v157_v32 = vshll.u32 %v2455_v39, %v145_v29 }
  0x29   :  { %v158_v24 = vshrl.u32 %v2456_v41, %v146_v54  ;;  %v160_v34 = vshll.u32 %v2456_v41, %v145_v29  ;;  %v161_v36 = vshrl.u32 %v2457_v49, %v146_v54  ;;  %v82_v38 = vmul.u32 %v2506_v28, %v66_v13 }
  0x2a   :  { %v156_v40 = vor.u32 %v155_v26, %v154_v25  ;;  %vm163_vm7 = vcmp.lt.s32.totalorder %v2517_v43, 1  ;;  %vm164_vm8 = vcmp.lt.s32.totalorder %v2517_v43, 2  ;;  %vm84_vm9 = vc.u32 %v2539_v18, %v2542_v19 }
  0x2b   :  { %v85_v42 = vadd.s32 1, %v2543_v20  ;;  %v159_v44 = vor.u32 %v158_v24, %v157_v32  ;;  %vm165_vm10 = vcmp.lt.s32.totalorder %v2517_v43, 3  ;;  %v162_v45 = vor.u32 %v161_v36, %v160_v34 }
  0x2c   :  { %vm166_vm11 = vcmp.lt.s32.totalorder %v2517_v43, 4  ;;  %v167_v29 = vsel %vm163_vm7, %v147_v11, %v150_v21  ;;  %v171_v46 = vsel %vm163_vm7, %v150_v21, %v153_v22  ;;  %v175_v50 = vsel %vm163_vm7, %v153_v22, %v156_v40 }
  0x2d   :  { %v86_v47 = vsel %vm84_vm9, %v85_v42, %v2543_v20  ;;  %v168_v28 = vsel %vm166_vm11, %v156_v40, 2102212464  ;;  %v172_v48 = vsel %vm166_vm11, %v159_v44, 920167782  ;;  %v176_v54 = vsel %vm166_vm11, %v162_v45, 1326507024 }
  0x2e   :  { %v87_v51 = vadd.s32 %v86_v47, %v82_v38  ;;  %v169_v52 = vsel %vm165_vm10, %v153_v22, %v168_v28  ;;  %v173_v53 = vsel %vm165_vm10, %v156_v40, %v172_v48  ;;  %v177_v57 = vsel %vm165_vm10, %v159_v44, %v176_v54 }
  0x2f   :  { %v170_v55 = vsel %vm164_vm8, %v167_v29, %v169_v52  ;;  %v174_v56 = vsel %vm164_vm8, %v171_v46, %v173_v53  ;;  %v559_v58 = vsel %vm558_vm6, %v2510_v31, 0  ;;  %v178_v60 = vsel %vm164_vm8, %v175_v50, %v177_v57 }
  0x30   :  { %v88_v59 = vadd.s32 536870912, %v87_v51  ;;  %v2569_v61 = vmul.u32.u64.low %v2508_v30, %v174_v56  ;;  %v2570_v62 = vmul.u32.u64.high %v2508_v30, %v174_v56, %v2569_v61  ;;  %v561_v9 = vand.u32 31, %v559_v58 }
  0x31   :  { %v2574_v63 = vmul.u32.u64.low %v2508_v30, %v178_v60  ;;  %v2575_v6 = vmul.u32.u64.high %v2508_v30, %v178_v60, %v2574_v63  ;;  %v186_v10 = vmul.u32 %v2508_v30, %v170_v55  ;;  %v2581_v43 = vand.u32 8388607, %v547_v27 }
  0x32   :  { %v89_v8 = vshrl.u32 %v88_v59, 30  ;;  %v189_v31 = vadd.s32 1, %v2570_v62  ;;  %v446_v12 = vand.u32 2139095040, %v2503_v23  ;;  %v562_v15 = vsub.s32 32, %v561_v9 }
  0x33   :  { %vm188_vm12 = vc.u32 %v2575_v6, %v2569_v61  ;;  %v2591_v16 = vmul.f32 12.566371, %v2482_v1  ;;  %v555_v20 = vor.u32 8388608, %v2581_v43  ;;  %v443_v21 = vand.u32 2147483647, %v2503_v23 }
  0x34   :  { %v90_v11 = vshll.u32 %v89_v8, 30  ;;  %v190_v14 = vsel %vm188_vm12, %v189_v31, %v2570_v62  ;;  %v447_v22 = vshrl.u32 %v446_v12, 23  ;;  %v83_v25 = vadd.s32 %v2542_v19, %v2539_v18 }
  0x35   :  { %v191_v30 = vadd.s32 %v190_v14, %v186_v10  ;;  %v2597_v32 = vshrl.u32 %v559_v58, 5  ;;  %v564_v24 = vshll.u32 %v2452_v33, %v561_v9  ;;  %v565_v36 = vshrl.u32 %v2453_v35, %v562_v15 }
  0x36   :  { %v2586_v13 = vsub.s32 %v87_v51, %v90_v11  ;;  %v567_v38 = vshll.u32 %v2453_v35, %v561_v9  ;;  %v568_v40 = vshrl.u32 %v2454_v37, %v562_v15  ;;  %v570_v19 = vshll.u32 %v2454_v37, %v561_v9 }
  0x37   :  { %v192_v26 = vadd.s32 536870912, %v191_v30  ;;  %v571_v42 = vshrl.u32 %v2455_v39, %v562_v15  ;;  %v573_v44 = vshll.u32 %v2455_v39, %v561_v9  ;;  %v113_v45 = vsub.s32 4, %v89_v8 }
  0x38   :  { %v93_v17 = vsub.s32 0, %v2586_v13  ;;  %v574_v29 = vshrl.u32 %v2456_v41, %v562_v15  ;;  %v2239_v46 = vadd.s32 4294967169, %v447_v22  ;;  %vm579_vm15 = vcmp.lt.s32.totalorder %v2597_v32, 1 }
  0x39   :  { %v2610_v18 = vshrl.u32 %v192_v26, 30  ;;  %vm581_vm0 = vcmp.lt.s32.totalorder %v2597_v32, 3  ;;  %vm582_vm1 = vcmp.lt.s32.totalorder %v2597_v32, 4  ;;  %v576_v50 = vshll.u32 %v2456_v41, %v561_v9 }
  0x3a   :  { %v2224_v1 = vmin.u32 %v93_v17, %v2586_v13  ;;  %v575_v48 = vor.u32 %v574_v29, %v573_v44  ;;  %v577_v51 = vshrl.u32 %v2457_v49, %v562_v15  ;;  %v566_v53 = vor.u32 %v565_v36, %v564_v24 }
  0x3b   :  { %v194_v47 = vshll.u32 %v2610_v18, 30  ;;  %v569_v54 = vor.u32 %v568_v40, %v567_v38  ;;  %v572_v55 = vor.u32 %v571_v42, %v570_v19  ;;  %v114_v56 = vsel %vm29_vm13, %v113_v45, %v89_v8 }
  0x3c   :  { %v95_v5 = vclz %v2224_v1  ;;  %v563_v57 = vshrl.u32 %v2452_v33, %v562_v15  ;;  %v588_v58 = vsel %vm582_vm1, %v575_v48, 920167782  ;;  %vm580_vm3 = vcmp.lt.s32.totalorder %v2597_v32, 2 }
  0x3d   :  { %v2622_v52 = vsub.s32 %v191_v30, %v194_v47  ;;  %v584_v62 = vsel %vm582_vm1, %v572_v55, 2102212464  ;;  %v578_v11 = vor.u32 %v577_v51, %v576_v50  ;;  %v116_v8 = vsel %vm2602_vm14, 0, %v114_v56 }
  0x3e   :  { %v2225_v28 = vadd.s32 4294967294, %v95_v5  ;;  %v587_v43 = vsel %vm579_vm15, %v566_v53, %v569_v54  ;;  %v589_v12 = vsel %vm581_vm0, %v572_v55, %v588_v58  ;;  %v583_v30 = vsel %vm579_vm15, %v563_v57, %v566_v53 }
  0x3f   :  { %v197_v60 = vsub.s32 0, %v2622_v52  ;;  %v591_v22 = vsel %vm579_vm15, %v569_v54, %v572_v55  ;;  %v595_v26 = vshll.u32 %v555_v20, 8  ;;  %v2649_v24 = vand.u32 8388607, %v443_v21 }
  0x40   :  { %vm2226_vm2 = vcmp.lt.s32.totalorder %v2225_v28, 0  ;;  %v592_v38 = vsel %vm582_vm1, %v578_v11, 1326507024  ;;  %v120_v40 = vadd.s32 3, %v116_v8  ;;  %vm133_vm4 = vcmp.lt.s32.totalorder %v2488_v3, 0 }
  0x41   :  { %v98_v59 = vsel %vm2226_vm2, 0, %v2225_v28  ;;  %v2228_v31 = vmin.u32 %v197_v60, %v2622_v52  ;;  %v187_v19 = vadd.s32 %v2569_v61, %v2575_v6  ;;  %v593_v45 = vsel %vm581_vm0, %v575_v48, %v592_v38 }
  0x42   :  { %v99_v63 = vsub.s32 32, %v98_v59  ;;  %v100_v9 = vshll.u32 %v2586_v13, %v98_v59  ;;  %v103_v10 = vsub.s32 4294967266, %v98_v59  ;;  %v585_v13 = vsel %vm581_vm0, %v569_v54, %v584_v62 }
  0x43   :  { %v199_v17 = vclz %v2228_v31  ;;  %v586_v20 = vsel %vm580_vm3, %v583_v30, %v585_v13  ;;  %v453_v29 = vadd.s32 1, %v2239_v46  ;;  %v594_v47 = vsel %vm580_vm3, %v591_v22, %v593_v45 }
  0x44   :  { %v101_v14 = vshrl.u32 %v83_v25, %v99_v63  ;;  %v104_v15 = vadd.s32 127, %v103_v10  ;;  %v590_v25 = vsel %vm580_vm3, %v587_v43, %v589_v12  ;;  %vm2674_vm7 = vcmp.le.f32.partialorder %v131_v7, 0.7853982 }
  0x45   :  { %v2229_v42 = vadd.s32 4294967294, %v199_v17  ;;  %v2664_v28 = vmul.u32.u64.low %v595_v26, %v590_v25  ;;  %v2665_v50 = vmul.u32.u64.high %v595_v26, %v590_v25, %v2664_v28  ;;  %vm454_vm6 = vcmp.gt.s32.totalorder %v453_v29, 0 }
  0x46   :  { %v102_v1 = vor.u32 %v101_v14, %v100_v9  ;;  %v105_v36 = vshll.u32 %v104_v15, 23  ;;  %v2668_v6 = vmul.u32.u64.low %v595_v26, %v594_v47  ;;  %v2669_v53 = vmul.u32.u64.high %v595_v26, %v594_v47, %v2668_v6 }
  0x47   :  { %vm2230_vm5 = vcmp.lt.s32.totalorder %v2229_v42, 0  ;;  %v217_v46 = vsub.s32 4, %v2610_v18  ;;  %v602_v57 = vmul.u32 %v595_v26, %v586_v20  ;;  %v455_v58 = vsel %vm454_vm6, %v453_v29, 0 }
  0x48   :  { %v106_v44 = vor.u32 4788187, %v105_v36  ;;  %v109_v5 = vcvt.s32.f32 %v102_v1  ;;  %v202_v61 = vsel %vm2230_vm5, 0, %v2229_v42  ;;  %v605_v62 = vadd.s32 1, %v2665_v50 }
  0x49   :  { %v203_v54 = vsub.s32 32, %v202_v61  ;;  %v204_v55 = vshll.u32 %v2622_v52, %v202_v61  ;;  %v207_v56 = vsub.s32 4294967266, %v202_v61  ;;  %v451_v63 = vor.u32 8388608, %v2649_v24 }
  0x4a   :  { %v107_v51 = vand.u32 2147483647, %v106_v44  ;;  %v2681_v9 = vand.u32 3, %v116_v8  ;;  %vm604_vm8 = vc.u32 %v2669_v53, %v2664_v28  ;;  %v457_v7 = vand.u32 31, %v455_v58 }
  0x4b   :  { %v205_v59 = vshrl.u32 %v187_v19, %v203_v54  ;;  %v208_v60 = vadd.s32 127, %v207_v56  ;;  %v2685_v10 = vand.u32 3, %v120_v40  ;;  %v606_v43 = vsel %vm604_vm8, %v605_v62, %v2665_v50 }
  0x4c   :  { %v110_v48 = vmul.f32 %v109_v5, %v107_v51  ;;  %v218_v14 = vsel %vm133_vm4, %v217_v46, %v2610_v18  ;;  %v607_v15 = vadd.s32 %v606_v43, %v602_v57  ;;  %v458_v8 = vsub.s32 32, %v457_v7 }
  0x4d   :  { %v206_v11 = vor.u32 %v205_v59, %v204_v55  ;;  %v209_v31 = vshll.u32 %v208_v60, 23  ;;  %v460_v22 = vshll.u32 %v2452_v33, %v457_v7  ;;  %v463_v1 = vshll.u32 %v2453_v35, %v457_v7 }
  0x4e   :  { %v111_v52 = vxor.u32 2147483648, %v110_v48  ;;  %v608_v26 = vadd.s32 536870912, %v607_v15  ;;  %v461_v24 = vshrl.u32 %v2453_v35, %v458_v8  ;;  %v464_v18 = vshrl.u32 %v2454_v37, %v458_v8 }
  0x4f   :  { %v210_v13 = vor.u32 4788187, %v209_v31  ;;  %v213_v17 = vcvt.s32.f32 %v206_v11  ;;  %v466_v25 = vshll.u32 %v2454_v37, %v457_v7  ;;  %v456_v34 = vshrl.u32 %v455_v58, 5 }
  0x50   :  { %v112_v12 = vsel %vm29_vm13, %v111_v52, %v110_v48  ;;  %v2701_v38 = vshrl.u32 %v608_v26, 30  ;;  %v467_v40 = vshrl.u32 %v2455_v39, %v458_v8  ;;  %v469_v19 = vshll.u32 %v2455_v39, %v457_v7 }
  0x51   :  { %v115_v30 = vsel %vm2602_vm14, %v2485_v2, %v112_v12  ;;  %v211_v36 = vand.u32 2147483647, %v210_v13  ;;  %v220_v20 = vsel %vm2674_vm7, 0, %v218_v14  ;;  %v470_v44 = vshrl.u32 %v2456_v41, %v458_v8 }
  0x52   :  { %2361 = vcosq.f32 %v115_v30  ;;  %v472_v5 = vshll.u32 %v2456_v41, %v457_v7  ;;  %v610_v45 = vshll.u32 %v2701_v38, 30  ;;  %v459_v29 = vshrl.u32 %v2452_v33, %v458_v8 }
  0x53   :  { %2363 = vsinq.f32 %v115_v30  ;;  %v214_v42 = vmul.f32 %v213_v17, %v211_v36  ;;  %v462_v47 = vor.u32 %v461_v24, %v460_v22  ;;  %v473_v50 = vshrl.u32 %v2457_v49, %v458_v8 }
  0x54   :  { %vm333_vm9 = vcmp.eq.s32.totalorder %v2681_v9, 2  ;;  %v465_v61 = vor.u32 %v464_v18, %v463_v1  ;;  %v468_v6 = vor.u32 %v467_v40, %v466_v25  ;;  %v471_v54 = vor.u32 %v470_v44, %v469_v19 }
  0x55   :  { %v215_v51 = vxor.u32 2147483648, %v214_v42  ;;  %vm330_vm10 = vcmp.eq.s32.totalorder %v2681_v9, 0  ;;  %v224_v55 = vadd.s32 3, %v220_v20  ;;  %v2714_v56 = vsub.s32 %v607_v15, %v610_v45 }
  0x56   :  { %vm475_vm11 = vcmp.lt.s32.totalorder %v456_v34, 1  ;;  %vm478_vm12 = vcmp.lt.s32.totalorder %v456_v34, 4  ;;  %vm329_vm13 = vcmp.lt.s32.totalorder %v2681_v9, 2  ;;  %vm122_vm14 = vcmp.lt.s32.totalorder %v2685_v10, 2 }
  0x57   :  { %v216_v48 = vsel %vm133_vm4, %v215_v51, %v214_v42  ;;  %v474_v46 = vor.u32 %v473_v50, %v472_v5  ;;  %vm477_vm15 = vcmp.lt.s32.totalorder %v456_v34, 3  ;;  %v480_v57 = vsel %vm478_vm12, %v468_v6, 2102212464 }
  0x58   :  { %vm119_vm0 = vweird.f32 %v2485_v2  ;;  %v219_v58 = vsel %vm2674_vm7, %v2488_v3, %v216_v48  ;;  %v613_v59 = vsub.s32 0, %v2714_v56  ;;  %vm476_vm1 = vcmp.lt.s32.totalorder %v456_v34, 2 }
  0x59   :  { %v2726_v60 = vshll.u32 %v451_v63, 8  ;;  %2365 = vcosq.f32 %v219_v58  ;;  %v479_v62 = vsel %vm475_vm11, %v459_v29, %v462_v47  ;;  %v483_v52 = vsel %vm475_vm11, %v462_v47, %v465_v61 }
  0x5a   :  { %v484_v7 = vsel %vm478_vm12, %v471_v54, 920167782  ;;  %2367 = vsinq.f32 %v219_v58  ;;  %v2244_v11 = vmin.u32 %v613_v59, %v2714_v56  ;;  %v481_v31 = vsel %vm477_vm15, %v465_v61, %v480_v57 }
  0x5b   :  { %v485_v32 = vsel %vm477_vm15, %v468_v6, %v484_v7  ;;  %vm123_vm2 = vcmp.eq.s32.totalorder %v2685_v10, 0  ;;  %v487_v63 = vsel %vm475_vm11, %v465_v61, %v468_v6  ;;  %v488_v12 = vsel %vm478_vm12, %v474_v46, 1326507024 }
  0x5c   :  { %v486_v43 = vsel %vm476_vm1, %v483_v52, %v485_v32  ;;  %vm126_vm3 = vcmp.eq.s32.totalorder %v2685_v10, 2  ;;  %v2739_v14 = vand.u32 3, %v220_v20  ;;  %v2741_v15 = vand.u32 3, %v224_v55 }
  0x5d   :  { %vm549_vm4 = vcmp.lt.s32.totalorder %v2491_v4, 0  ;;  %v615_v8 = vclz %v2244_v11  ;;  %v482_v13 = vsel %vm476_vm1, %v479_v62, %v481_v31  ;;  %v489_v17 = vsel %vm477_vm15, %v471_v54, %v488_v12 }
  0x5e   :  { %v2747_v22 = vmul.u32.u64.low %v2726_v60, %v486_v43  ;;  %v2748_v26 = vmul.u32.u64.high %v2726_v60, %v486_v43, %v2747_v22  ;;  %v603_v36 = vadd.s32 %v2664_v28, %v2669_v53  ;;  %v490_v25 = vsel %vm476_vm1, %v487_v63, %v489_v17 }
  0x5f   :  { %v2362_v30 = vpop.eup %2361  ;;  %v2245_v18 = vadd.s32 4294967294, %v615_v8  ;;  %vm2756_vm5 = vcmp.le.f32.partialorder %v547_v27, 0.7853982  ;;  %v633_v42 = vsub.s32 4, %v2701_v38  ;;  %vm432_vm6 = vcmp.lt.s32.totalorder %v2739_v14, 2 }
  0x60   :  { %v2364_v24 = vpop.eup %2363  ;;  %v127_v1 = vxor.u32 2147483648, %v2362_v30  ;;  %v2762_v20 = vmul.u32.u64.low %v2726_v60, %v490_v25  ;;  %v2763_v44 = vmul.u32.u64.high %v2726_v60, %v490_v25, %v2762_v20  ;;  %v498_v27 = vmul.u32 %v2726_v60, %v482_v13 }
  0x61   :  { %v124_v40 = vxor.u32 2147483648, %v2364_v24  ;;  %vm2246_vm7 = vcmp.lt.s32.totalorder %v2245_v18, 0  ;;  %vm223_vm8 = vweird.f32 %v2488_v3  ;;  %v501_v29 = vadd.s32 1, %v2748_v26 }
  0x62   :  { %v335_v5 = vsel %vm333_vm9, %v127_v1, %v2364_v24  ;;  %v128_v28 = vsel %vm126_vm3, %v127_v1, %v2364_v24  ;;  %v618_v45 = vsel %vm2246_vm7, 0, %v2245_v18  ;;  %vm433_vm9 = vcmp.eq.s32.totalorder %v2739_v14, 0 }
  0x63   :  { %v332_v53 = vsel %vm330_vm10, %v2362_v30, %v124_v40  ;;  %v125_v34 = vsel %vm123_vm2, %v2362_v30, %v124_v40  ;;  %v619_v51 = vsub.s32 32, %v618_v45  ;;  %v620_v61 = vshll.u32 %v2714_v56, %v618_v45 }
  0x64   :  { %v336_v47 = vsel %vm329_vm13, %v332_v53, %v335_v5  ;;  %v129_v50 = vsel %vm122_vm14, %v125_v34, %v128_v28  ;;  %v623_v55 = vsub.s32 4294967266, %v618_v45  ;;  %vm436_vm10 = vcmp.eq.s32.totalorder %v2739_v14, 2 }
  0x65   :  { %v337_v6 = vsel %vm119_vm0, nan, %v336_v47  ;;  %v130_v54 = vsel %vm119_vm0, nan, %v129_v50  ;;  %vm226_vm11 = vcmp.lt.s32.totalorder %v2741_v15, 2  ;;  %v621_v9 = vshrl.u32 %v603_v36, %v619_v51 }
  0x66   :  { %2115 = vrot.lane.b32.xlu1 %v337_v6, %s2458_s0  ;;  %2107 = vrot.lane.b32.xlu0 %v130_v54, %s2459_s13  ;;  %vm500_vm12 = vc.u32 %v2763_v44, %v2747_v22  ;;  %v624_v10 = vadd.s32 127, %v623_v55  ;;  %v634_v2 = vsel %vm549_vm4, %v633_v42, %v2701_v38  ;;  %v966_v48 = vand.u32 2139095040, %v2591_v16  ;;  %v2366_v46 = vpop.eup %2365 }
  0x67   :  { %v502_v56 = vsel %vm500_vm12, %v501_v29, %v2748_v26  ;;  %vm230_vm13 = vcmp.eq.s32.totalorder %v2741_v15, 2  ;;  %v622_v57 = vor.u32 %v621_v9, %v620_v61  ;;  %v963_v59 = vand.u32 2147483647, %v2591_v16  ;;  %v2368_v60 = vpop.eup %2367 }
  0x68   :  { %v503_v58 = vadd.s32 %v502_v56, %v498_v27  ;;  %v231_v62 = vxor.u32 2147483648, %v2366_v46  ;;  %vm227_vm14 = vcmp.eq.s32.totalorder %v2741_v15, 0  ;;  %v625_v52 = vshll.u32 %v624_v10, 23 }
  0x69   :  { %v967_v7 = vshrl.u32 %v966_v48, 23  ;;  %v228_v11 = vxor.u32 2147483648, %v2368_v60  ;;  %v629_v31 = vcvt.s32.f32 %v622_v57  ;;  %v636_v38 = vsel %vm2756_vm5, 0, %v634_v2 }
  0x6a   :  { %v504_v32 = vadd.s32 536870912, %v503_v58  ;;  %v438_v43 = vsel %vm436_vm10, %v231_v62, %v2368_v60  ;;  %v232_v63 = vsel %vm230_vm13, %v231_v62, %v2368_v60  ;;  %v626_v12 = vor.u32 4788187, %v625_v52 }
  0x6b   :  { %v2259_v8 = vadd.s32 4294967169, %v967_v7  ;;  %v435_v30 = vsel %vm433_vm9, %v2366_v46, %v228_v11  ;;  %v229_v13 = vsel %vm227_vm14, %v2366_v46, %v228_v11  ;;  %v970_v26 = vand.u32 8388607, %v963_v59 }
  0x6c   :  { %v2807_v17 = vshrl.u32 %v504_v32, 30  ;;  %v439_v24 = vsel %vm432_vm6, %v435_v30, %v438_v43  ;;  %v233_v1 = vsel %vm226_vm11, %v229_v13, %v232_v63  ;;  %v627_v36 = vand.u32 2147483647, %v626_v12 }
  0x6d   :  { %v973_v18 = vadd.s32 1, %v2259_v8  ;;  %v440_v25 = vsel %vm223_vm8, nan, %v439_v24  ;;  %v234_v40 = vsel %vm223_vm8, nan, %v233_v1  ;;  %v2821_v20 = vmul.f32 12.566371, %v2480_v0 }
  0x6e   :  { %v506_v42 = vshll.u32 %v2807_v17, 30  ;;  %2117 = vrot.lane.b32.xlu1 %v440_v25, %s2458_s0  ;;  %2109 = vrot.lane.b32.xlu0 %v234_v40, %s2459_s13  ;;  %v630_v14 = vmul.f32 %v629_v31, %v627_v36  ;;  %v640_v15 = vadd.s32 3, %v636_v38  ;;  %v971_v53 = vor.u32 8388608, %v970_v26 }
  0x6f   :  { %vm974_vm15 = vcmp.gt.s32.totalorder %v973_v18, 0  ;;  %v862_v45 = vand.u32 2139095040, %v2821_v20  ;;  %v499_v51 = vadd.s32 %v2747_v22, %v2763_v44  ;;  %v2839_v6 = vand.u32 3, %v636_v38 }
  0x70   :  { %v2825_v5 = vsub.s32 %v503_v58, %v506_v42  ;;  %v975_v28 = vsel %vm974_vm15, %v973_v18, 0  ;;  %v631_v27 = vxor.u32 2147483648, %v630_v14  ;;  %v2831_v29 = vand.u32 3, %v640_v15 }
  0x71   :  { %v977_v34 = vand.u32 31, %v975_v28  ;;  %v2843_v9 = vshll.u32 %v971_v53, 8  ;;  %v976_v2 = vshrl.u32 %v975_v28, 5  ;;  %v863_v56 = vshrl.u32 %v862_v45, 23 }
  0x72   :  { %v509_v3 = vsub.s32 0, %v2825_v5  ;;  %v632_v0 = vsel %vm549_vm4, %v631_v27, %v630_v14  ;;  %vm646_vm0 = vcmp.eq.s32.totalorder %v2831_v29, 2  ;;  %vm445_vm1 = vcmp.lt.s32.totalorder %v2503_v23, 0 }
  0x73   :  { %v978_v47 = vsub.s32 32, %v977_v34  ;;  %v635_v50 = vsel %vm2756_vm5, %v2491_v4, %v632_v0  ;;  %v980_v54 = vshll.u32 %v2452_v33, %v977_v34  ;;  %v983_v55 = vshll.u32 %v2453_v35, %v977_v34 }
  0x74   :  { %v2240_v61 = vmin.u32 %v509_v3, %v2825_v5  ;;  %2369 = vcosq.f32 %v635_v50  ;;  %v986_v44 = vshll.u32 %v2454_v37, %v977_v34  ;;  %v989_v58 = vshll.u32 %v2455_v39, %v977_v34 }
  0x75   :  { %2371 = vsinq.f32 %v635_v50  ;;  %v979_v19 = vshrl.u32 %v2452_v33, %v978_v47  ;;  %v981_v48 = vshrl.u32 %v2453_v35, %v978_v47  ;;  %v984_v22 = vshrl.u32 %v2454_v37, %v978_v47 }
  0x76   :  { %v511_v10 = vclz %v2240_v61  ;;  %v987_v57 = vshrl.u32 %v2455_v39, %v978_v47  ;;  %v990_v60 = vshrl.u32 %v2456_v41, %v978_v47  ;;  %v992_v7 = vshll.u32 %v2456_v41, %v977_v34 }
  0x77   :  { %v982_v62 = vor.u32 %v981_v48, %v980_v54  ;;  %v985_v52 = vor.u32 %v984_v22, %v983_v55  ;;  %v993_v11 = vshrl.u32 %v2457_v49, %v978_v47  ;;  %vm852_vm3 = vcmp.eq.s32.totalorder %v2839_v6, 2 }
  0x78   :  { %v2241_v46 = vadd.s32 4294967294, %v511_v10  ;;  %v988_v31 = vor.u32 %v987_v57, %v986_v44  ;;  %v991_v38 = vor.u32 %v990_v60, %v989_v58  ;;  %vm995_vm4 = vcmp.lt.s32.totalorder %v976_v2, 1 }
  0x79   :  { %vm643_vm5 = vcmp.eq.s32.totalorder %v2831_v29, 0  ;;  %v994_v43 = vor.u32 %v993_v11, %v992_v7  ;;  %vm996_vm6 = vcmp.lt.s32.totalorder %v976_v2, 2  ;;  %vm997_vm7 = vcmp.lt.s32.totalorder %v976_v2, 3 }
  0x7a   :  { %vm2242_vm2 = vcmp.lt.s32.totalorder %v2241_v46, 0  ;;  %vm642_vm8 = vcmp.lt.s32.totalorder %v2831_v29, 2  ;;  %vm998_vm9 = vcmp.lt.s32.totalorder %v976_v2, 4  ;;  %vm639_vm10 = vweird.f32 %v2491_v4 }
  0x7b   :  { %v514_v32 = vsel %vm2242_vm2, 0, %v2241_v46  ;;  %vm2863_vm11 = vcmp.le.f32.partialorder %v443_v21, 0.7853982  ;;  %v999_v13 = vsel %vm995_vm4, %v979_v19, %v982_v62  ;;  %v1000_v26 = vsel %vm998_vm9, %v988_v31, 2102212464 }
  0x7c   :  { %v515_v63 = vsub.s32 32, %v514_v32  ;;  %v516_v12 = vshll.u32 %v2825_v5, %v514_v32  ;;  %v519_v8 = vsub.s32 4294967266, %v514_v32  ;;  %v1003_v24 = vsel %vm995_vm4, %v982_v62, %v985_v52 }
  0x7d   :  { %v1004_v1 = vsel %vm998_vm9, %v991_v38, 920167782  ;;  %v1001_v25 = vsel %vm997_vm7, %v985_v52, %v1000_v26  ;;  %v529_v42 = vsub.s32 4, %v2807_v17  ;;  %v1007_v21 = vsel %vm995_vm4, %v985_v52, %v988_v31 }
  0x7e   :  { %v517_v36 = vshrl.u32 %v499_v51, %v515_v63  ;;  %v520_v18 = vadd.s32 127, %v519_v8  ;;  %v1005_v40 = vsel %vm997_vm7, %v988_v31, %v1004_v1  ;;  %v1008_v15 = vsel %vm998_vm9, %v994_v43, 1326507024 }
  0x7f   :  { %v1006_v14 = vsel %vm996_vm6, %v1003_v24, %v1005_v40  ;;  %v1002_v27 = vsel %vm996_vm6, %v999_v13, %v1001_v25  ;;  %v1009_v53 = vsel %vm997_vm7, %v991_v38, %v1008_v15  ;;  %v2255_v0 = vadd.s32 4294967169, %v863_v56 }
  0x80   :  { %v518_v5 = vor.u32 %v517_v36, %v516_v12  ;;  %v521_v28 = vshll.u32 %v520_v18, 23  ;;  %v1010_v34 = vsel %vm996_vm6, %v1007_v21, %v1009_v53  ;;  %v530_v2 = vsel %vm445_vm1, %v529_v42, %v2807_v17 }
  0x81   :  { %v2878_v3 = vmul.u32.u64.low %v2843_v9, %v1006_v14  ;;  %v2879_v45 = vmul.u32.u64.high %v2843_v9, %v1006_v14, %v2878_v3  ;;  %v2370_v47 = vpop.eup %2369  ;;  %v2883_v61 = vmul.u32.u64.low %v2843_v9, %v1010_v34  ;;  %v2884_v54 = vmul.u32.u64.high %v2843_v9, %v1010_v34, %v2883_v61 }
  0x82   :  { %v522_v50 = vor.u32 4788187, %v521_v28  ;;  %v525_v51 = vcvt.s32.f32 %v518_v5  ;;  %v2372_v55 = vpop.eup %2371  ;;  %v647_v10 = vxor.u32 2147483648, %v2370_v47  ;;  %vm849_vm12 = vcmp.eq.s32.totalorder %v2839_v6, 0 }
  0x83   :  { %v869_v19 = vadd.s32 1, %v2255_v0  ;;  %v644_v48 = vxor.u32 2147483648, %v2372_v55  ;;  %vm848_vm13 = vcmp.lt.s32.totalorder %v2839_v6, 2  ;;  %v859_v56 = vand.u32 2147483647, %v2821_v20 }
  0x84   :  { %v523_v22 = vand.u32 2147483647, %v522_v50  ;;  %v648_v44 = vsel %vm646_vm0, %v647_v10, %v2372_v55  ;;  %v854_v46 = vsel %vm852_vm3, %v647_v10, %v2372_v55  ;;  %v1018_v57 = vmul.u32 %v2843_v9, %v1002_v27 }
  0x85   :  { %v1021_v58 = vadd.s32 1, %v2879_v45  ;;  %v645_v17 = vsel %vm643_vm5, %v2370_v47, %v644_v48  ;;  %v532_v62 = vsel %vm2863_vm11, 0, %v530_v2  ;;  %v851_v52 = vsel %vm849_vm12, %v2370_v47, %v644_v48  ;;  %v2947_v2 = vld [vmem:[#allocation2 + $0x8] sm:$0xff] }
  0x86   :  { %v526_v60 = vmul.f32 %v525_v51, %v523_v22  ;;  %v649_v7 = vsel %vm642_vm8, %v645_v17, %v648_v44  ;;  %v855_v11 = vsel %vm848_vm13, %v851_v52, %v854_v46  ;;  %vm1020_vm14 = vc.u32 %v2884_v54, %v2878_v3 }
  0x87   :  { %vm870_vm15 = vcmp.gt.s32.totalorder %v869_v19, 0  ;;  %v650_v6 = vsel %vm639_vm10, nan, %v649_v7  ;;  %v1022_v31 = vsel %vm1020_vm14, %v1021_v58, %v2879_v45  ;;  %v536_v43 = vadd.s32 3, %v532_v62 }
  0x88   :  { %v527_v9 = vxor.u32 2147483648, %v526_v60  ;;  %2125 = vrot.lane.b32.xlu1 %v650_v6, %s2460_s14  ;;  %v1023_v38 = vadd.s32 %v1022_v31, %v1018_v57  ;;  %v871_v32 = vsel %vm870_vm15, %v869_v19, 0  ;;  %v856_v63 = vsel %vm639_vm10, nan, %v855_v11 }
  0x89   :  { %v873_v12 = vand.u32 31, %v871_v32  ;;  %v866_v26 = vand.u32 8388607, %v859_v56  ;;  %v2919_v24 = vshrl.u32 %v871_v32, 5  ;;  %v2928_v40 = vand.u32 3, %v532_v62 }
  0x8a   :  { %v528_v29 = vsel %vm445_vm1, %v527_v9, %v526_v60  ;;  %v1024_v13 = vadd.s32 536870912, %v1023_v38  ;;  %v537_v61 = vand.u32 3, %v536_v43  ;;  %v2950_v19 = vmul.f32 50.265484, %v2947_v2 }
  0x8b   :  { %v531_v8 = vsel %vm2863_vm11, %v2503_v23, %v528_v29  ;;  %v874_v1 = vsub.s32 32, %v873_v12  ;;  %v876_v36 = vshll.u32 %v2452_v33, %v873_v12  ;;  %v879_v18 = vshll.u32 %v2453_v35, %v873_v12 }
  0x8c   :  { %2373 = vcosq.f32 %v531_v8  ;;  %2133 = vrot.lane.b32.xlu1 %v856_v63, %s2461_s15  ;;  %v2924_v4 = vshrl.u32 %v1024_v13, 30  ;;  %v882_v30 = vshll.u32 %v2454_v37, %v873_v12  ;;  %v885_v25 = vshll.u32 %v2455_v39, %v873_v12 }
  0x8d   :  { %2375 = vsinq.f32 %v531_v8  ;;  %v877_v42 = vshrl.u32 %v2453_v35, %v874_v1  ;;  %v880_v14 = vshrl.u32 %v2454_v37, %v874_v1  ;;  %v883_v21 = vshrl.u32 %v2455_v39, %v874_v1 }
  0x8e   :  { %v1026_v15 = vshll.u32 %v2924_v4, 30  ;;  %v867_v5 = vor.u32 8388608, %v866_v26  ;;  %v886_v28 = vshrl.u32 %v2456_v41, %v874_v1  ;;  %v888_v27 = vshll.u32 %v2456_v41, %v873_v12 }
  0x8f   :  { %v875_v53 = vshrl.u32 %v2452_v33, %v874_v1  ;;  %v878_v34 = vor.u32 %v877_v42, %v876_v36  ;;  %v881_v45 = vor.u32 %v880_v14, %v879_v18  ;;  %v889_v0 = vshrl.u32 %v2457_v49, %v874_v1 }
  0x90   :  { %v2938_v47 = vsub.s32 %v1023_v38, %v1026_v15  ;;  %v884_v50 = vor.u32 %v883_v21, %v882_v30  ;;  %v887_v51 = vor.u32 %v886_v28, %v885_v25  ;;  %vm891_vm0 = vcmp.lt.s32.totalorder %v2919_v24, 1 }
  0x91   :  { %vm746_vm1 = vcmp.eq.s32.totalorder %v2928_v40, 0  ;;  %v890_v55 = vor.u32 %v889_v0, %v888_v27  ;;  %vm893_vm2 = vcmp.lt.s32.totalorder %v2919_v24, 3  ;;  %vm745_vm3 = vcmp.lt.s32.totalorder %v2928_v40, 2 }
  0x92   :  { %v1029_v10 = vsub.s32 0, %v2938_v47  ;;  %vm892_vm4 = vcmp.lt.s32.totalorder %v2919_v24, 2  ;;  %vm894_vm5 = vcmp.lt.s32.totalorder %v2919_v24, 4  ;;  %vm535_vm6 = vweird.f32 %v2503_v23 }
  0x93   :  { %v896_v48 = vsel %vm894_vm5, %v884_v50, 2102212464  ;;  %v899_v22 = vsel %vm891_vm0, %v878_v34, %v881_v45  ;;  %v900_v44 = vsel %vm894_vm5, %v887_v51, 920167782  ;;  %v907_v46 = vshll.u32 %v867_v5, 8 }
  0x94   :  { %v2260_v57 = vmin.u32 %v1029_v10, %v2938_v47  ;;  %v895_v58 = vsel %vm891_vm0, %v875_v53, %v878_v34  ;;  %v897_v17 = vsel %vm893_vm2, %v881_v45, %v896_v48  ;;  %v901_v60 = vsel %vm893_vm2, %v884_v50, %v900_v44 }
  0x95   :  { %vm749_vm7 = vcmp.eq.s32.totalorder %v2928_v40, 2  ;;  %v902_v62 = vsel %vm892_vm4, %v899_v22, %v901_v60  ;;  %v903_v52 = vsel %vm891_vm0, %v881_v45, %v884_v50  ;;  %v904_v7 = vsel %vm894_vm5, %v890_v55, 1326507024 }
  0x96   :  { %vm538_vm8 = vcmp.lt.s32.totalorder %v537_v61, 2  ;;  %vm539_vm9 = vcmp.eq.s32.totalorder %v537_v61, 0  ;;  %v1031_v11 = vclz %v2260_v57  ;;  %v1798_v6 = vand.u32 2139095040, %v2950_v19 }
  0x97   :  { %v898_v9 = vsel %vm892_vm4, %v895_v58, %v897_v17  ;;  %v905_v31 = vsel %vm893_vm2, %v887_v51, %v904_v7  ;;  %v2972_v38 = vmul.u32.u64.low %v907_v46, %v902_v62  ;;  %v2973_v32 = vmul.u32.u64.high %v907_v46, %v902_v62, %v2972_v38 }
  0x98   :  { %vm542_vm10 = vcmp.eq.s32.totalorder %v537_v61, 2  ;;  %v1019_v43 = vadd.s32 %v2878_v3, %v2884_v54  ;;  %v2261_v63 = vadd.s32 4294967294, %v1031_v11  ;;  %v906_v12 = vsel %vm892_vm4, %v903_v52, %v905_v31 }
  0x99   :  { %v2374_v29 = vpop.eup %2373  ;;  %v1049_v26 = vsub.s32 4, %v2924_v4  ;;  %v2981_v1 = vmul.u32.u64.low %v907_v46, %v906_v12  ;;  %v2982_v36 = vmul.u32.u64.high %v907_v46, %v906_v12, %v2981_v1  ;;  %v914_v30 = vmul.u32 %v907_v46, %v898_v9 }
  0x9a   :  { %v2376_v8 = vpop.eup %2375  ;;  %v543_v13 = vxor.u32 2147483648, %v2374_v29  ;;  %vm2262_vm11 = vcmp.lt.s32.totalorder %v2261_v63, 0  ;;  %v1799_v25 = vshrl.u32 %v1798_v6, 23  ;;  %v917_v54 = vadd.s32 1, %v2973_v32 }
  0x9b   :  { %v540_v18 = vxor.u32 2147483648, %v2376_v8  ;;  %v1034_v3 = vsel %vm2262_vm11, 0, %v2261_v63  ;;  %vm965_vm12 = vcmp.lt.s32.totalorder %v2591_v16, 0  ;;  %vm916_vm13 = vc.u32 %v2982_v36, %v2972_v38 }
  0x9c   :  { %v544_v42 = vsel %vm542_vm10, %v543_v13, %v2376_v8  ;;  %v751_v14 = vsel %vm749_vm7, %v543_v13, %v2376_v8  ;;  %v1035_v15 = vsub.s32 32, %v1034_v3  ;;  %v1036_v5 = vshll.u32 %v2938_v47, %v1034_v3 }
  0x9d   :  { %v541_v24 = vsel %vm539_vm9, %v2374_v29, %v540_v18  ;;  %v748_v21 = vsel %vm746_vm1, %v2374_v29, %v540_v18  ;;  %v1039_v53 = vsub.s32 4294967266, %v1034_v3  ;;  %v1050_v0 = vsel %vm965_vm12, %v1049_v26, %v2924_v4  ;;  %v3027_v29 = vld [vmem:[#allocation2] sm:$0xff] }
  0x9e   :  { %v545_v28 = vsel %vm538_vm8, %v541_v24, %v544_v42  ;;  %v752_v27 = vsel %vm745_vm3, %v748_v21, %v751_v14  ;;  %v1037_v45 = vshrl.u32 %v1019_v43, %v1035_v15  ;;  %v918_v40 = vsel %vm916_vm13, %v917_v54, %v2973_v32 }
  0x9f   :  { %v546_v34 = vsel %vm535_vm6, nan, %v545_v28  ;;  %v1040_v47 = vadd.s32 127, %v1039_v53  ;;  %v2291_v50 = vadd.s32 4294967169, %v1799_v25  ;;  %v753_v51 = vsel %vm535_vm6, nan, %v752_v27 }
  0xa0   :  { %2123 = vrot.lane.b32.xlu0 %v546_v34, %s2460_s14  ;;  %vm3008_vm14 = vcmp.le.f32.partialorder %v963_v59, 0.7853982  ;;  %v1038_v55 = vor.u32 %v1037_v45, %v1036_v5  ;;  %v919_v4 = vadd.s32 %v918_v40, %v914_v30  ;;  %v1795_v46 = vand.u32 2147483647, %v2950_v19 }
  0xa1   :  { %v1041_v10 = vshll.u32 %v1040_v47, 23  ;;  %v1052_v48 = vsel %vm3008_vm14, 0, %v1050_v0  ;;  %v1805_v22 = vadd.s32 1, %v2291_v50  ;;  %v3030_v43 = vmul.f32 50.265484, %v3027_v29 }
  0xa2   :  { %v920_v44 = vadd.s32 536870912, %v919_v4  ;;  %v1045_v57 = vcvt.s32.f32 %v1038_v55  ;;  %v1056_v58 = vadd.s32 3, %v1052_v48  ;;  %v1802_v7 = vand.u32 8388607, %v1795_v46 }
  0xa3   :  { %v1042_v23 = vor.u32 4788187, %v1041_v10  ;;  %vm1806_vm15 = vcmp.gt.s32.totalorder %v1805_v22, 0  ;;  %v3025_v32 = vand.u32 3, %v1052_v48  ;;  %v1694_v15 = vand.u32 2139095040, %v3030_v43 }
  0xa4   :  { %2131 = vrot.lane.b32.xlu0 %v753_v51, %s2461_s15  ;;  %v3016_v59 = vshrl.u32 %v920_v44, 30  ;;  %v1807_v17 = vsel %vm1806_vm15, %v1805_v22, 0  ;;  %v3021_v9 = vand.u32 3, %v1056_v58  ;;  %v1803_v1 = vor.u32 8388608, %v1802_v7 }
  0xa5   :  { %v1043_v60 = vand.u32 2147483647, %v1042_v23  ;;  %v1809_v62 = vand.u32 31, %v1807_v17  ;;  %v1808_v21 = vshrl.u32 %v1807_v17, 5  ;;  %v915_v5 = vadd.s32 %v2972_v38, %v2982_v36 }
  0xa6   :  { %v922_v52 = vshll.u32 %v3016_v59, 30  ;;  %v3050_v34 = vshll.u32 %v1803_v1, 8  ;;  %v1691_v45 = vand.u32 2147483647, %v3030_v43  ;;  %vm861_vm0 = vcmp.lt.s32.totalorder %v2821_v20, 0 }
  0xa7   :  { %v1046_v11 = vmul.f32 %v1045_v57, %v1043_v60  ;;  %v1810_v6 = vsub.s32 32, %v1809_v62  ;;  %v1812_v12 = vshll.u32 %v2452_v33, %v1809_v62  ;;  %v1815_v13 = vshll.u32 %v2453_v35, %v1809_v62 }
  0xa8   :  { %v3023_v31 = vsub.s32 %v919_v4, %v922_v52  ;;  %v1818_v30 = vshll.u32 %v2454_v37, %v1809_v62  ;;  %v1821_v14 = vshll.u32 %v2455_v39, %v1809_v62  ;;  %v1824_v50 = vshll.u32 %v2456_v41, %v1809_v62 }
  0xa9   :  { %v1047_v63 = vxor.u32 2147483648, %v1046_v11  ;;  %v1813_v8 = vshrl.u32 %v2453_v35, %v1810_v6  ;;  %v1816_v18 = vshrl.u32 %v2454_v37, %v1810_v6  ;;  %v1819_v42 = vshrl.u32 %v2455_v39, %v1810_v6 }
  0xaa   :  { %v925_v26 = vsub.s32 0, %v3023_v31  ;;  %v1822_v3 = vshrl.u32 %v2456_v41, %v1810_v6  ;;  %v1811_v0 = vshrl.u32 %v2452_v33, %v1810_v6  ;;  %v1825_v61 = vshrl.u32 %v2457_v49, %v1810_v6 }
  0xab   :  { %v1048_v25 = vsel %vm965_vm12, %v1047_v63, %v1046_v11  ;;  %v1814_v28 = vor.u32 %v1813_v8, %v1812_v12  ;;  %v1817_v27 = vor.u32 %v1816_v18, %v1815_v13  ;;  %v1820_v47 = vor.u32 %v1819_v42, %v1818_v30 }
  0xac   :  { %v1051_v54 = vsel %vm3008_vm14, %v2591_v16, %v1048_v25  ;;  %v2256_v24 = vmin.u32 %v925_v26, %v3023_v31  ;;  %v1823_v40 = vor.u32 %v1822_v3, %v1821_v14  ;;  %vm1827_vm1 = vcmp.lt.s32.totalorder %v1808_v21, 1 }
  0xad   :  { %2377 = vcosq.f32 %v1051_v54  ;;  %v1695_v38 = vshrl.u32 %v1694_v15, 23  ;;  %vm1828_vm2 = vcmp.lt.s32.totalorder %v1808_v21, 2  ;;  %vm1829_vm3 = vcmp.lt.s32.totalorder %v1808_v21, 3 }
  0xae   :  { %2379 = vsinq.f32 %v1051_v54  ;;  %v927_v53 = vclz %v2256_v24  ;;  %vm1830_vm4 = vcmp.lt.s32.totalorder %v1808_v21, 4  ;;  %v1835_v36 = vsel %vm1827_vm1, %v1814_v28, %v1817_v27 }
  0xaf   :  { %vm1062_vm5 = vcmp.eq.s32.totalorder %v3021_v9, 2  ;;  %v1826_v55 = vor.u32 %v1825_v61, %v1824_v50  ;;  %v1832_v4 = vsel %vm1830_vm4, %v1820_v47, 2102212464  ;;  %v1836_v10 = vsel %vm1830_vm4, %v1823_v40, 920167782 }
  0xb0   :  { %v2257_v51 = vadd.s32 4294967294, %v927_v53  ;;  %vm1059_vm7 = vcmp.eq.s32.totalorder %v3021_v9, 0  ;;  %vm3064_vm8 = vcmp.le.f32.partialorder %v859_v56, 0.7853982  ;;  %vm1265_vm9 = vcmp.eq.s32.totalorder %v3025_v32, 0 }
  0xb1   :  { %v1831_v44 = vsel %vm1827_vm1, %v1811_v0, %v1814_v28  ;;  %v1833_v23 = vsel %vm1829_vm3, %v1817_v27, %v1832_v4  ;;  %v1837_v57 = vsel %vm1829_vm3, %v1820_v47, %v1836_v10  ;;  %vm1058_vm10 = vcmp.lt.s32.totalorder %v3021_v9, 2 }
  0xb2   :  { %vm2258_vm6 = vcmp.lt.s32.totalorder %v2257_v51, 0  ;;  %vm1264_vm11 = vcmp.lt.s32.totalorder %v3025_v32, 2  ;;  %v1839_v56 = vsel %vm1827_vm1, %v1817_v27, %v1820_v47  ;;  %vm1055_vm12 = vweird.f32 %v2591_v16 }
  0xb3   :  { %v930_v22 = vsel %vm2258_vm6, 0, %v2257_v51  ;;  %v945_v62 = vsub.s32 4, %v3016_v59  ;;  %v1838_v52 = vsel %vm1828_vm2, %v1835_v36, %v1837_v57  ;;  %v1840_v7 = vsel %vm1830_vm4, %v1826_v55, 1326507024 }
  0xb4   :  { %v931_v58 = vsub.s32 32, %v930_v22  ;;  %v932_v17 = vshll.u32 %v3023_v31, %v930_v22  ;;  %v935_v60 = vsub.s32 4294967266, %v930_v22  ;;  %v2287_v11 = vadd.s32 4294967169, %v1695_v38 }
  0xb5   :  { %v1834_v12 = vsel %vm1828_vm2, %v1831_v44, %v1833_v23  ;;  %v1841_v31 = vsel %vm1829_vm3, %v1823_v40, %v1840_v7  ;;  %v3084_v13 = vmul.u32.u64.low %v3050_v34, %v1838_v52  ;;  %v3085_v26 = vmul.u32.u64.high %v3050_v34, %v1838_v52, %v3084_v13 }
  0xb6   :  { %v933_v6 = vshrl.u32 %v915_v5, %v931_v58  ;;  %v936_v63 = vadd.s32 127, %v935_v60  ;;  %v1842_v8 = vsel %vm1828_vm2, %v1839_v56, %v1841_v31  ;;  %v1701_v1 = vadd.s32 1, %v2287_v11 }
  0xb7   :  { %v3089_v25 = vmul.u32.u64.low %v3050_v34, %v1842_v8  ;;  %v3090_v42 = vmul.u32.u64.high %v3050_v34, %v1842_v8, %v3089_v25  ;;  %v946_v14 = vsel %vm861_vm0, %v945_v62, %v3016_v59  ;;  %vm1268_vm13 = vcmp.eq.s32.totalorder %v3025_v32, 2 }
  0xb8   :  { %v934_v18 = vor.u32 %v933_v6, %v932_v17  ;;  %v937_v30 = vshll.u32 %v936_v63, 23  ;;  %vm1702_vm14 = vcmp.gt.s32.totalorder %v1701_v1, 0  ;;  %v3097_v3 = vmul.f32 25.132742, %v2947_v2 }
  0xb9   :  { %v1850_v15 = vmul.u32 %v3050_v34, %v1834_v12  ;;  %v1703_v5 = vsel %vm1702_vm14, %v1701_v1, 0  ;;  %v1853_v53 = vadd.s32 1, %v3085_v26  ;;  %v1698_v0 = vand.u32 8388607, %v1691_v45 }
  0xba   :  { %v2378_v54 = vpop.eup %2377  ;;  %v938_v24 = vor.u32 4788187, %v937_v30  ;;  %v941_v21 = vcvt.s32.f32 %v934_v18  ;;  %v1705_v59 = vand.u32 31, %v1703_v5  ;;  %v948_v2 = vsel %vm3064_vm8, 0, %v946_v14 }
  0xbb   :  { %v2380_v28 = vpop.eup %2379  ;;  %v1063_v27 = vxor.u32 2147483648, %v2378_v54  ;;  %vm1852_vm15 = vc.u32 %v3090_v42, %v3084_v13  ;;  %v3120_v44 = vshrl.u32 %v1703_v5, 5  ;;  %v952_v63 = vadd.s32 3, %v948_v2 }
  0xbc   :  { %v1060_v47 = vxor.u32 2147483648, %v2380_v28  ;;  %v939_v40 = vand.u32 2147483647, %v938_v24  ;;  %v1854_v51 = vsel %vm1852_vm15, %v1853_v53, %v3085_v26  ;;  %v1706_v61 = vsub.s32 32, %v1705_v59 }
  0xbd   :  { %v1064_v34 = vsel %vm1062_vm5, %v1063_v27, %v2380_v28  ;;  %v1270_v50 = vsel %vm1268_vm13, %v1063_v27, %v2380_v28  ;;  %v1855_v4 = vadd.s32 %v1854_v51, %v1850_v15  ;;  %v1708_v23 = vshll.u32 %v2452_v33, %v1705_v59 }
  0xbe   :  { %v1061_v38 = vsel %vm1059_vm7, %v2378_v54, %v1060_v47  ;;  %v942_v36 = vmul.f32 %v941_v21, %v939_v40  ;;  %v1267_v55 = vsel %vm1265_vm9, %v2378_v54, %v1060_v47  ;;  %v1709_v9 = vshrl.u32 %v2453_v35, %v1706_v61 }
  0xbf   :  { %v1065_v10 = vsel %vm1058_vm10, %v1061_v38, %v1064_v34  ;;  %v1271_v22 = vsel %vm1264_vm11, %v1267_v55, %v1270_v50  ;;  %v1856_v60 = vadd.s32 536870912, %v1855_v4  ;;  %v1711_v32 = vshll.u32 %v2453_v35, %v1705_v59 }
  0xc0   :  { %v1066_v57 = vsel %vm1055_vm12, nan, %v1065_v10  ;;  %v943_v58 = vxor.u32 2147483648, %v942_v36  ;;  %v1272_v17 = vsel %vm1055_vm12, nan, %v1271_v22  ;;  %v1712_v56 = vshrl.u32 %v2454_v37, %v1706_v61 }
  0xc1   :  { %2141 = vrot.lane.b32.xlu1 %v1066_v57, %s2462_s16  ;;  %v1714_v62 = vshll.u32 %v2454_v37, %v1705_v59  ;;  %v3134_v7 = vshrl.u32 %v1856_v60, 30  ;;  %v1715_v16 = vshrl.u32 %v2455_v39, %v1706_v61  ;;  %v1717_v11 = vshll.u32 %v2455_v39, %v1705_v59 }
  0xc2   :  { %v944_v52 = vsel %vm861_vm0, %v943_v58, %v942_v36  ;;  %v1699_v12 = vor.u32 8388608, %v1698_v0  ;;  %v1718_v31 = vshrl.u32 %v2456_v41, %v1706_v61  ;;  %v1710_v26 = vor.u32 %v1709_v9, %v1708_v23 }
  0xc3   :  { %v947_v6 = vsel %vm3064_vm8, %v2821_v20, %v944_v52  ;;  %v1858_v8 = vshll.u32 %v3134_v7, 30  ;;  %v1713_v1 = vor.u32 %v1712_v56, %v1711_v32  ;;  %v1720_v30 = vshll.u32 %v2456_v41, %v1705_v59 }
  0xc4   :  { %2381 = vcosq.f32 %v947_v6  ;;  %v1719_v18 = vor.u32 %v1718_v31, %v1717_v11  ;;  %v1721_v25 = vshrl.u32 %v2457_v49, %v1706_v61  ;;  %v3146_v48 = vand.u32 3, %v948_v2 }
  0xc5   :  { %2383 = vsinq.f32 %v947_v6  ;;  %2149 = vrot.lane.b32.xlu1 %v1272_v17, %s2463_s17  ;;  %v3148_v14 = vsub.s32 %v1855_v4, %v1858_v8  ;;  %v1716_v54 = vor.u32 %v1715_v16, %v1714_v62  ;;  %vm1723_vm0 = vcmp.lt.s32.totalorder %v3120_v44, 1 }
  0xc6   :  { %v1722_v24 = vor.u32 %v1721_v25, %v1720_v30  ;;  %vm1725_vm1 = vcmp.lt.s32.totalorder %v3120_v44, 3  ;;  %vm1726_vm2 = vcmp.lt.s32.totalorder %v3120_v44, 4  ;;  %v1382_v21 = vand.u32 2139095040, %v3097_v3 }
  0xc7   :  { %v1861_v15 = vsub.s32 0, %v3148_v14  ;;  %v1707_v5 = vshrl.u32 %v2452_v33, %v1706_v61  ;;  %vm1724_vm3 = vcmp.lt.s32.totalorder %v3120_v44, 2  ;;  %v1728_v28 = vsel %vm1726_vm2, %v1716_v54, 2102212464 }
  0xc8   :  { %v1731_v27 = vsel %vm1723_vm0, %v1710_v26, %v1713_v1  ;;  %v1732_v53 = vsel %vm1726_vm2, %v1719_v18, 920167782  ;;  %v1739_v0 = vshll.u32 %v1699_v12, 8  ;;  %v953_v59 = vand.u32 3, %v952_v63 }
  0xc9   :  { %v2292_v47 = vmin.u32 %v1861_v15, %v3148_v14  ;;  %v1733_v40 = vsel %vm1725_vm1, %v1716_v54, %v1732_v53  ;;  %v1379_v2 = vand.u32 2147483647, %v3097_v3  ;;  %vm1161_vm4 = vcmp.lt.s32.totalorder %v3146_v48, 2 }
  0xca   :  { %v1734_v34 = vsel %vm1724_vm3, %v1731_v27, %v1733_v40  ;;  %v1735_v50 = vsel %vm1723_vm0, %v1713_v1, %v1716_v54  ;;  %v1736_v51 = vsel %vm1726_vm2, %v1722_v24, 1326507024  ;;  %v1383_v61 = vshrl.u32 %v1382_v21, 23 }
  0xcb   :  { %vm951_vm5 = vweird.f32 %v2821_v20  ;;  %vm1162_vm6 = vcmp.eq.s32.totalorder %v3146_v48, 0  ;;  %vm1797_vm7 = vcmp.lt.s32.totalorder %v2950_v19, 0  ;;  %v1863_v38 = vclz %v2292_v47 }
  0xcc   :  { %v1727_v36 = vsel %vm1723_vm0, %v1707_v5, %v1710_v26  ;;  %v1729_v55 = vsel %vm1725_vm1, %v1713_v1, %v1728_v28  ;;  %v1737_v4 = vsel %vm1725_vm1, %v1719_v18, %v1736_v51  ;;  %v2275_v23 = vadd.s32 4294967169, %v1383_v61 }
  0xcd   :  { %v3183_v10 = vmul.u32.u64.low %v1739_v0, %v1734_v34  ;;  %v3184_v22 = vmul.u32.u64.high %v1739_v0, %v1734_v34, %v3183_v10  ;;  %vm954_vm8 = vcmp.lt.s32.totalorder %v953_v59, 2  ;;  %vm1165_vm9 = vcmp.eq.s32.totalorder %v3146_v48, 2 }
  0xce   :  { %v2293_v57 = vadd.s32 4294967294, %v1863_v38  ;;  %v1738_v58 = vsel %vm1724_vm3, %v1735_v50, %v1737_v4  ;;  %vm955_vm10 = vcmp.eq.s32.totalorder %v953_v59, 0  ;;  %vm3192_vm11 = vcmp.le.f32.partialorder %v1795_v46, 0.7853982 }
  0xcf   :  { %v3196_v60 = vmul.u32.u64.low %v1739_v0, %v1738_v58  ;;  %v3197_v9 = vmul.u32.u64.high %v1739_v0, %v1738_v58, %v3196_v60  ;;  %v1389_v32 = vadd.s32 1, %v2275_v23  ;;  %vm958_vm12 = vcmp.eq.s32.totalorder %v953_v59, 2 }
  0xd0   :  { %v1851_v56 = vadd.s32 %v3084_v13, %v3090_v42  ;;  %vm2294_vm13 = vcmp.lt.s32.totalorder %v2293_v57, 0  ;;  %v1730_v62 = vsel %vm1724_vm3, %v1727_v36, %v1729_v55  ;;  %v1881_v11 = vsub.s32 4, %v3134_v7 }
  0xd1   :  { %v2382_v52 = vpop.eup %2381  ;;  %v1866_v16 = vsel %vm2294_vm13, 0, %v2293_v57  ;;  %v1749_v46 = vadd.s32 1, %v3184_v22  ;;  %vm1390_vm14 = vcmp.gt.s32.totalorder %v1389_v32, 0  ;;  %v1746_v1 = vmul.u32 %v1739_v0, %v1730_v62 }
  0xd2   :  { %v2384_v6 = vpop.eup %2383  ;;  %v959_v63 = vxor.u32 2147483648, %v2382_v52  ;;  %v1867_v12 = vsub.s32 32, %v1866_v16  ;;  %v1868_v31 = vshll.u32 %v3148_v14, %v1866_v16  ;;  %v1871_v8 = vsub.s32 4294967266, %v1866_v16 }
  0xd3   :  { %v956_v26 = vxor.u32 2147483648, %v2384_v6  ;;  %vm1748_vm15 = vc.u32 %v3197_v9, %v3183_v10  ;;  %v1391_v13 = vsel %vm1390_vm14, %v1389_v32, 0  ;;  %v1882_v14 = vsel %vm1797_vm7, %v1881_v11, %v3134_v7 }
  0xd4   :  { %v960_v42 = vsel %vm958_vm12, %v959_v63, %v2384_v6  ;;  %v1167_v44 = vsel %vm1165_vm9, %v959_v63, %v2384_v6  ;;  %v1869_v18 = vshrl.u32 %v1851_v56, %v1867_v12  ;;  %v1872_v30 = vadd.s32 127, %v1871_v8 }
  0xd5   :  { %v957_v25 = vsel %vm955_vm10, %v2382_v52, %v956_v26  ;;  %v1164_v54 = vsel %vm1162_vm6, %v2382_v52, %v956_v26  ;;  %v1750_v24 = vsel %vm1748_vm15, %v1749_v46, %v3184_v22  ;;  %v1386_v0 = vand.u32 8388607, %v1379_v2 }
  0xd6   :  { %v961_v21 = vsel %vm954_vm8, %v957_v25, %v960_v42  ;;  %v1168_v15 = vsel %vm1161_vm4, %v1164_v54, %v1167_v44  ;;  %v1870_v5 = vor.u32 %v1869_v18, %v1868_v31  ;;  %v1873_v28 = vshll.u32 %v1872_v30, 23 }
  0xd7   :  { %v962_v27 = vsel %vm951_vm5, nan, %v961_v21  ;;  %v1751_v53 = vadd.s32 %v1750_v24, %v1746_v1  ;;  %v1393_v47 = vand.u32 31, %v1391_v13  ;;  %v3228_v59 = vsel %vm3192_vm11, 0, %v1882_v14 }
  0xd8   :  { %2139 = vrot.lane.b32.xlu0 %v962_v27, %s2462_s16  ;;  %v1874_v7 = vor.u32 4788187, %v1873_v28  ;;  %v1877_v40 = vcvt.s32.f32 %v1870_v5  ;;  %v1392_v48 = vshrl.u32 %v1391_v13, 5  ;;  %v1169_v34 = vsel %vm951_vm5, nan, %v1168_v15 }
  0xd9   :  { %v1752_v50 = vadd.s32 536870912, %v1751_v53  ;;  %v1394_v51 = vsub.s32 32, %v1393_v47  ;;  %v1396_v61 = vshll.u32 %v2452_v33, %v1393_v47  ;;  %v1399_v36 = vshll.u32 %v2453_v35, %v1393_v47 }
  0xda   :  { %v1875_v38 = vand.u32 2147483647, %v1874_v7  ;;  %v1402_v55 = vshll.u32 %v2454_v37, %v1393_v47  ;;  %v1405_v4 = vshll.u32 %v2455_v39, %v1393_v47  ;;  %v1408_v58 = vshll.u32 %v2456_v41, %v1393_v47 }
  0xdb   :  { %v1753_v22 = vshrl.u32 %v1752_v50, 30  ;;  %v1397_v23 = vshrl.u32 %v2453_v35, %v1394_v51  ;;  %v1400_v57 = vshrl.u32 %v2454_v37, %v1394_v51  ;;  %v1403_v60 = vshrl.u32 %v2455_v39, %v1394_v51 }
  0xdc   :  { %2147 = vrot.lane.b32.xlu0 %v1169_v34, %s2463_s17  ;;  %v1878_v20 = vmul.f32 %v1877_v40, %v1875_v38  ;;  %v1406_v32 = vshrl.u32 %v2456_v41, %v1394_v51  ;;  %v1409_v56 = vshrl.u32 %v2457_v49, %v1394_v51  ;;  %v1888_v62 = vadd.s32 3, %v3228_v59 }
  0xdd   :  { %v1754_v52 = vshll.u32 %v1753_v22, 30  ;;  %v1387_v16 = vor.u32 8388608, %v1386_v0  ;;  %vm1411_vm0 = vcmp.lt.s32.totalorder %v1392_v48, 1  ;;  %v1398_v46 = vor.u32 %v1397_v23, %v1396_v61 }
  0xde   :  { %v1879_v11 = vxor.u32 2147483648, %v1878_v20  ;;  %v1401_v6 = vor.u32 %v1400_v57, %v1399_v36  ;;  %v1407_v63 = vor.u32 %v1406_v32, %v1405_v4  ;;  %v1395_v31 = vshrl.u32 %v2452_v33, %v1394_v51 }
  0xdf   :  { %v3244_v12 = vsub.s32 %v1751_v53, %v1754_v52  ;;  %v1404_v8 = vor.u32 %v1403_v60, %v1402_v55  ;;  %vm1414_vm1 = vcmp.lt.s32.totalorder %v1392_v48, 4  ;;  %v1410_v1 = vor.u32 %v1409_v56, %v1408_v58 }
  0xe0   :  { %v1880_v26 = vsel %vm1797_vm7, %v1879_v11, %v1878_v20  ;;  %vm1413_vm2 = vcmp.lt.s32.totalorder %v1392_v48, 3  ;;  %v3250_v13 = vmul.f32 25.132742, %v3027_v29  ;;  %vm1412_vm3 = vcmp.lt.s32.totalorder %v1392_v48, 2 }
  0xe1   :  { %v1883_v42 = vsel %vm3192_vm11, %v2950_v19, %v1880_v26  ;;  %v1757_v44 = vsub.s32 0, %v3244_v12  ;;  %v1416_v18 = vsel %vm1414_vm1, %v1404_v8, 2102212464  ;;  %v1419_v30 = vsel %vm1411_vm0, %v1398_v46, %v1401_v6 }
  0xe2   :  { %2385 = vcosq.f32 %v1883_v42  ;;  %v1420_v25 = vsel %vm1414_vm1, %v1407_v63, 920167782  ;;  %v1427_v54 = vshll.u32 %v1387_v16, 8  ;;  %v1415_v29 = vsel %vm1411_vm0, %v1395_v31, %v1398_v46 }
  0xe3   :  { %2387 = vsinq.f32 %v1883_v42  ;;  %v2288_v14 = vmin.u32 %v1757_v44, %v3244_v12  ;;  %v1421_v24 = vsel %vm1413_vm2, %v1404_v8, %v1420_v25  ;;  %v1417_v17 = vsel %vm1413_vm2, %v1401_v6, %v1416_v18 }
  0xe4   :  { %v1422_v21 = vsel %vm1412_vm3, %v1419_v30, %v1421_v24  ;;  %v1423_v15 = vsel %vm1411_vm0, %v1401_v6, %v1404_v8  ;;  %v1424_v5 = vsel %vm1414_vm1, %v1410_v1, 1326507024  ;;  %v1777_v27 = vsub.s32 4, %v1753_v22 }
  0xe5   :  { %v1759_v28 = vclz %v2288_v14  ;;  %v1425_v53 = vsel %vm1413_vm2, %v1407_v63, %v1424_v5  ;;  %v3267_v0 = vmul.u32.u64.low %v1427_v54, %v1422_v21  ;;  %v3268_v47 = vmul.u32.u64.high %v1427_v54, %v1422_v21, %v3267_v0 }
  0xe6   :  { %v1418_v40 = vsel %vm1412_vm3, %v1415_v29, %v1417_v17  ;;  %v1426_v34 = vsel %vm1412_vm3, %v1423_v15, %v1425_v53  ;;  %v1278_v50 = vand.u32 2139095040, %v3250_v13  ;;  %v1889_v51 = vand.u32 3, %v1888_v62 }
  0xe7   :  { %v2289_v7 = vadd.s32 4294967294, %v1759_v28  ;;  %v3274_v61 = vmul.u32.u64.low %v1427_v54, %v1426_v34  ;;  %v3275_v38 = vmul.u32.u64.high %v1427_v54, %v1426_v34, %v3274_v61  ;;  %vm1693_vm4 = vcmp.lt.s32.totalorder %v3030_v43, 0 }
  0xe8   :  { %v1747_v36 = vadd.s32 %v3183_v10, %v3197_v9  ;;  %v1279_v55 = vshrl.u32 %v1278_v50, 23  ;;  %v1778_v23 = vsel %vm1693_vm4, %v1777_v27, %v1753_v22  ;;  %v1434_v57 = vmul.u32 %v1427_v54, %v1418_v40 }
  0xe9   :  { %vm2290_vm5 = vcmp.lt.s32.totalorder %v2289_v7, 0  ;;  %v1437_v48 = vadd.s32 1, %v3268_v47  ;;  %vm1887_vm6 = vweird.f32 %v2950_v19  ;;  %vm1890_vm7 = vcmp.lt.s32.totalorder %v1889_v51, 2 }
  0xea   :  { %v1762_v4 = vsel %vm2290_vm5, 0, %v2289_v7  ;;  %v2271_v32 = vadd.s32 4294967169, %v1279_v55  ;;  %vm3287_vm8 = vcmp.le.f32.partialorder %v1691_v45, 0.7853982  ;;  %vm1436_vm9 = vc.u32 %v3275_v38, %v3267_v0 }
  0xeb   :  { %v1763_v58 = vsub.s32 32, %v1762_v4  ;;  %v1764_v20 = vshll.u32 %v3244_v12, %v1762_v4  ;;  %v1767_v60 = vsub.s32 4294967266, %v1762_v4  ;;  %v1438_v56 = vsel %vm1436_vm9, %v1437_v48, %v3268_v47 }
  0xec   :  { %v1285_v62 = vadd.s32 1, %v2271_v32  ;;  %vm1891_vm10 = vcmp.eq.s32.totalorder %v1889_v51, 0  ;;  %v3296_v52 = vsel %vm3287_vm8, 0, %v1778_v23  ;;  %v1439_v16 = vadd.s32 %v1438_v56, %v1434_v57 }
  0xed   :  { %v1765_v9 = vshrl.u32 %v1747_v36, %v1763_v58  ;;  %v1768_v22 = vadd.s32 127, %v1767_v60  ;;  %v1275_v11 = vand.u32 2147483647, %v3250_v13  ;;  %vm1894_vm11 = vcmp.eq.s32.totalorder %v1889_v51, 2 }
  0xee   :  { %vm1286_vm12 = vcmp.gt.s32.totalorder %v1285_v62, 0  ;;  %v1440_v31 = vadd.s32 536870912, %v1439_v16  ;;  %v3305_v26 = vand.u32 3, %v3228_v59  ;;  %v1784_v18 = vadd.s32 3, %v3296_v52 }
  0xef   :  { %v3299_v45 = vpop.eup %2385  ;;  %v1766_v46 = vor.u32 %v1765_v9, %v1764_v20  ;;  %v1769_v6 = vshll.u32 %v1768_v22, 23  ;;  %v1287_v8 = vsel %vm1286_vm12, %v1285_v62, 0  ;;  %v1282_v54 = vand.u32 8388607, %v1275_v11 }
  0xf0   :  { %v3301_v63 = vpop.eup %2387  ;;  %v1895_v12 = vxor.u32 2147483648, %v3299_v45  ;;  %v3310_v25 = vshrl.u32 %v1440_v31, 30  ;;  %v1289_v14 = vand.u32 31, %v1287_v8  ;;  %v3321_v28 = vand.u32 3, %v1784_v18 }
  0xf1   :  { %v1892_v1 = vxor.u32 2147483648, %v3301_v63  ;;  %v1770_v42 = vor.u32 4788187, %v1769_v6  ;;  %v1773_v44 = vcvt.s32.f32 %v1766_v46  ;;  %v1283_v53 = vor.u32 8388608, %v1282_v54 }
  0xf2   :  { %v1896_v30 = vsel %vm1894_vm11, %v1895_v12, %v3301_v63  ;;  %v1442_v17 = vshll.u32 %v3310_v25, 30  ;;  %v1290_v21 = vsub.s32 32, %v1289_v14  ;;  %vm2097_vm13 = vcmp.eq.s32.totalorder %v3305_v26, 0 }
  0xf3   :  { %v1893_v29 = vsel %vm1891_vm10, %v3299_v45, %v1892_v1  ;;  %v1771_v24 = vand.u32 2147483647, %v1770_v42  ;;  %v1288_v7 = vshrl.u32 %v1287_v8, 5  ;;  %v1292_v40 = vshll.u32 %v2452_v33, %v1289_v14 }
  0xf4   :  { %v1897_v59 = vsel %vm1890_vm7, %v1893_v29, %v1896_v30  ;;  %v3323_v27 = vsub.s32 %v1439_v16, %v1442_v17  ;;  %vm2100_vm14 = vcmp.eq.s32.totalorder %v3305_v26, 2  ;;  %v1293_v50 = vshrl.u32 %v2453_v35, %v1290_v21 }
  0xf5   :  { %v1898_v15 = vsel %vm1887_vm6, nan, %v1897_v59  ;;  %v1774_v5 = vmul.f32 %v1773_v44, %v1771_v24  ;;  %v1295_v51 = vshll.u32 %v2453_v35, %v1289_v14  ;;  %v1296_v61 = vshrl.u32 %v2454_v37, %v1290_v21 }
  0xf6   :  { %2165 = vrot.lane.b32.xlu1 %v1898_v15, %s2459_s13  ;;  %v1445_v34 = vsub.s32 0, %v3323_v27  ;;  %vm2096_vm15 = vcmp.lt.s32.totalorder %v3305_v26, 2  ;;  %v1435_v55 = vadd.s32 %v3267_v0, %v3275_v38  ;;  %v1298_v4 = vshll.u32 %v2454_v37, %v1289_v14 }
  0xf7   :  { %v1775_v47 = vxor.u32 2147483648, %v1774_v5  ;;  %v1299_v23 = vshrl.u32 %v2455_v39, %v1290_v21  ;;  %v3343_v48 = vshll.u32 %v1283_v53, 8  ;;  %v2102_v58 = vsel %vm2100_vm14, %v1895_v12, %v3301_v63 }
  0xf8   :  { %v2276_v35 = vmin.u32 %v1445_v34, %v3323_v27  ;;  %v1291_v20 = vshrl.u32 %v2452_v33, %v1290_v21  ;;  %v1301_v60 = vshll.u32 %v2455_v39, %v1289_v14  ;;  %vm1307_vm0 = vcmp.lt.s32.totalorder %v1288_v7, 1 }
  0xf9   :  { %v1776_v36 = vsel %vm1693_vm4, %v1775_v47, %v1774_v5  ;;  %v1294_v0 = vor.u32 %v1293_v50, %v1292_v40  ;;  %v1297_v38 = vor.u32 %v1296_v61, %v1295_v51  ;;  %v1300_v32 = vor.u32 %v1299_v23, %v1298_v4 }
  0xfa   :  { %v1779_v57 = vsel %vm3287_vm8, %v3030_v43, %v1776_v36  ;;  %v1447_v37 = vclz %v2276_v35  ;;  %v1302_v10 = vshrl.u32 %v2456_v41, %v1290_v21  ;;  %v1304_v9 = vshll.u32 %v2456_v41, %v1289_v14 }
  0xfb   :  { %2389 = vcosq.f32 %v1779_v57  ;;  %v1305_v22 = vshrl.u32 %v2457_v49, %v1290_v21  ;;  %vm1308_vm1 = vcmp.lt.s32.totalorder %v1288_v7, 2  ;;  %vm1309_vm2 = vcmp.lt.s32.totalorder %v1288_v7, 3 }
  0xfc   :  { %2391 = vsinq.f32 %v1779_v57  ;;  %v2277_v56 = vadd.s32 4294967294, %v1447_v37  ;;  %vm1310_vm3 = vcmp.lt.s32.totalorder %v1288_v7, 4  ;;  %v1303_v62 = vor.u32 %v1302_v10, %v1301_v60 }
  0xfd   :  { %v1306_v33 = vor.u32 %v1305_v22, %v1304_v9  ;;  %v1311_v39 = vsel %vm1307_vm0, %v1291_v20, %v1294_v0  ;;  %v1312_v16 = vsel %vm1310_vm3, %v1300_v32, 2102212464  ;;  %v1315_v6 = vsel %vm1307_vm0, %v1294_v0, %v1297_v38 }
  0xfe   :  { %vm2278_vm4 = vcmp.lt.s32.totalorder %v2277_v56, 0  ;;  %v1313_v46 = vsel %vm1309_vm2, %v1297_v38, %v1312_v16  ;;  %v2099_v41 = vsel %vm2097_vm13, %v3299_v45, %v1892_v1  ;;  %v1316_v49 = vsel %vm1310_vm3, %v1303_v62, 920167782 }
  0xff   :  { %v1450_v63 = vsel %vm2278_vm4, 0, %v2277_v56  ;;  %v1319_v12 = vsel %vm1307_vm0, %v1297_v38, %v1300_v32  ;;  %v1320_v31 = vsel %vm1310_vm3, %v1306_v33, 1326507024  ;;  %v1317_v18 = vsel %vm1309_vm2, %v1300_v32, %v1316_v49 }
 0x100   :  { %v1451_v8 = vsub.s32 32, %v1450_v63  ;;  %v1452_v42 = vshll.u32 %v3323_v27, %v1450_v63  ;;  %v1455_v44 = vsub.s32 4294967266, %v1450_v63  ;;  %v1318_v30 = vsel %vm1308_vm1, %v1315_v6, %v1317_v18 }
 0x101   :  { %v1321_v54 = vsel %vm1309_vm2, %v1303_v62, %v1320_v31  ;;  %v3364_v14 = vsel %vm2096_vm15, %v2099_v41, %v2102_v58  ;;  %v1992_v45 = vand.u32 3, %v3296_v52  ;;  %v1314_v24 = vsel %vm1308_vm1, %v1311_v39, %v1313_v46 }
 0x102   :  { %v1453_v1 = vshrl.u32 %v1435_v55, %v1451_v8  ;;  %v1456_v29 = vadd.s32 127, %v1455_v44  ;;  %v1322_v59 = vsel %vm1308_vm1, %v1319_v12, %v1321_v54  ;;  %vm1787_vm5 = vcmp.eq.s32.totalorder %v3321_v28, 0 }
 0x103   :  { %v3370_v17 = vmul.u32.u64.low %v3343_v48, %v1322_v59  ;;  %v3371_v21 = vmul.u32.u64.high %v3343_v48, %v1322_v59, %v3370_v17  ;;  %v3374_v15 = vmul.u32.u64.low %v3343_v48, %v1318_v30  ;;  %v3375_v5 = vmul.u32.u64.high %v3343_v48, %v1318_v30, %v3374_v15 }
 0x104   :  { %v1454_v27 = vor.u32 %v1453_v1, %v1452_v42  ;;  %v1457_v26 = vshll.u32 %v1456_v29, 23  ;;  %vm1790_vm7 = vcmp.eq.s32.totalorder %v3321_v28, 2  ;;  %v1330_v7 = vmul.u32 %v3343_v48, %v1314_v24 }
 0x105   :  { %vm1997_vm8 = vcmp.eq.s32.totalorder %v1992_v45, 2  ;;  %vm1332_vm9 = vc.u32 %v3371_v21, %v3374_v15  ;;  %v1333_v50 = vadd.s32 1, %v3375_v5  ;;  %vm1994_vm10 = vcmp.eq.s32.totalorder %v1992_v45, 0 }
 0x106   :  { %v1458_v53 = vor.u32 4788187, %v1457_v26  ;;  %v1461_v47 = vcvt.s32.f32 %v1454_v27  ;;  %vm1786_vm11 = vcmp.lt.s32.totalorder %v3321_v28, 2  ;;  %vm1993_vm12 = vcmp.lt.s32.totalorder %v1992_v45, 2 }
 0x107   :  { %vm1783_vm13 = vweird.f32 %v3030_v43  ;;  %v1334_v55 = vsel %vm1332_vm9, %v1333_v50, %v3375_v5  ;;  %vm1381_vm14 = vcmp.lt.s32.totalorder %v3097_v3, 0  ;;  %v1465_v20 = vsub.s32 4, %v3310_v25 }
 0x108   :  { %v2390_v52 = vpop.eup %2389  ;;  %v1459_v61 = vand.u32 2147483647, %v1458_v53  ;;  %v1335_v35 = vadd.s32 %v1334_v55, %v1330_v7  ;;  %vm1380_vm15 = vcmp.le.f32.partialorder %v1379_v2, 0.7853982  ;;  %v1331_v63 = vadd.s32 %v3374_v15, %v3371_v21 }
 0x109   :  { %v2392_v40 = vpop.eup %2391  ;;  %v1791_v34 = vxor.u32 2147483648, %v2390_v52  ;;  %v1466_v10 = vsel %vm1381_vm14, %v1465_v20, %v3310_v25  ;;  %vm1277_vm9 = vcmp.lt.s32.totalorder %v3250_v13, 0 }
 0x10a   :  { %v1788_v51 = vxor.u32 2147483648, %v2392_v40  ;;  %v1462_v57 = vmul.f32 %v1461_v47, %v1459_v61  ;;  %v1336_v38 = vadd.s32 536870912, %v1335_v35  ;;  %v1468_v56 = vsel %vm1380_vm15, 0, %v1466_v10 }
 0x10b   :  { %v1792_v36 = vsel %vm1790_vm7, %v1791_v34, %v2392_v40  ;;  %v1999_v4 = vsel %vm1997_vm8, %v1791_v34, %v2392_v40  ;;  %v1472_v39 = vadd.s32 3, %v1468_v56  ;;  %v1679_v46 = vand.u32 3, %v1468_v56  ;;  %v2108_v56 = vpop.permute.xlu0 %2107 }
 0x10c   :  { %v1789_v23 = vsel %vm1787_vm5, %v2390_v52, %v1788_v51  ;;  %v1996_v48 = vsel %vm1994_vm10, %v2390_v52, %v1788_v51  ;;  %v1463_v0 = vxor.u32 2147483648, %v1462_v57  ;;  %v1337_v32 = vshrl.u32 %v1336_v38, 30 }
 0x10d   :  { %v1793_v58 = vsel %vm1786_vm11, %v1789_v23, %v1792_v36  ;;  %v3391_v60 = vsel %vm1993_vm12, %v1996_v48, %v1999_v4  ;;  %v1473_v6 = vand.u32 3, %v1472_v39  ;;  %vm1681_vm0 = vcmp.eq.s32.totalorder %v1679_v46, 0  ;;  %v2403_v39 = vld [vmem:[#allocation2 + $0x8] sm:$0xff] }
 0x10e   :  { %v1794_v37 = vsel %vm1783_vm13, nan, %v1793_v58  ;;  %v1464_v28 = vsel %vm1381_vm14, %v1463_v0, %v1462_v57  ;;  %v1338_v22 = vshll.u32 %v1337_v32, 30  ;;  %vm1684_vm4 = vcmp.eq.s32.totalorder %v1679_v46, 2 }
 0x10f   :  { %2163 = vrot.lane.b32.xlu0 %v1794_v37, %s2459_s13  ;;  %v1467_v9 = vsel %vm1380_vm15, %v3097_v3, %v1464_v28  ;;  %vm1475_vm2 = vcmp.eq.s32.totalorder %v1473_v6, 0  ;;  %vm1478_vm3 = vcmp.eq.s32.totalorder %v1473_v6, 2  ;;  %vm1471_vm5 = vweird.f32 %v3097_v3 }
 0x110   :  { %2393 = vcosq.f32 %v1467_v9  ;;  %v1339_v62 = vsub.s32 %v1335_v35, %v1338_v22  ;;  %vm1474_vm7 = vcmp.lt.s32.totalorder %v1473_v6, 2  ;;  %vm1680_vm8 = vcmp.lt.s32.totalorder %v1679_v46, 2 }
 0x111   :  { %2395 = vsinq.f32 %v1467_v9  ;;  %v2104_v52 = vsel %vm1887_vm6, nan, %v3364_v14  ;;  %v1361_v7 = vsub.s32 4, %v1337_v32  ;;  %vm1276_vm10 = vcmp.le.f32.partialorder %v1275_v11, 0.7853982 }
 0x112   :  { %v1341_v33 = vsub.s32 0, %v1339_v62  ;;  %v2001_v28 = vsel %vm1783_vm13, nan, %v3391_v60  ;;  %vm2189_vm13 = vcmask 654336  }
 0x113   :  { %v1362_v50 = vsel %vm1277_vm9, %v1361_v7, %v1337_v32  ;;  %v2116_v32 = vpop.permute.xlu1 %2115 }
 0x114   :  { %v2272_v16 = vmin.u32 %v1341_v33, %v1339_v62  ;;  %v1364_v61 = vsel %vm1276_vm10, 0, %v1362_v50  ;;  %v2110_v33 = vpop.permute.xlu0 %2109 }
 0x115   :  { %v1368_v19 = vadd.s32 3, %v1364_v61  ;;  %v1576_v36 = vand.u32 3, %v1364_v61 }
 0x116   :  { %v1343_v2 = vclz %v2272_v16 }
 0x117   :  { %v1369_v14 = vand.u32 3, %v1368_v19  ;;  %vm1581_vm11 = vcmp.eq.s32.totalorder %v1576_v36, 2  ;;  %vm1578_vm14 = vcmp.eq.s32.totalorder %v1576_v36, 0  ;;  %v2118_v10 = vpop.permute.xlu1 %2117 }
 0x118   :  { %v2273_v41 = vadd.s32 4294967294, %v1343_v2 }
 0x119   :  { %vm1374_vm6 = vcmp.eq.s32.totalorder %v1369_v14, 2  ;;  %vm1371_vm12 = vcmp.eq.s32.totalorder %v1369_v14, 0  ;;  %vm1370_vm15 = vcmp.lt.s32.totalorder %v1369_v14, 2 }
 0x11a   :  { %vm2274_vm1 = vcmp.lt.s32.totalorder %v2273_v41, 0 }
 0x11b   :  { %v1346_v25 = vsel %vm2274_vm1, 0, %v2273_v41  ;;  %vm1367_vm1 = vweird.f32 %v3250_v13  ;;  %v2126_v9 = vpop.permute.xlu1 %2125  ;;  %v2124_v41 = vpop.permute.xlu0 %2123 }
 0x11c   :  { %v1347_v8 = vsub.s32 32, %v1346_v25  ;;  %v1348_v42 = vshll.u32 %v1339_v62, %v1346_v25  ;;  %v1351_v44 = vsub.s32 4294967266, %v1346_v25 }
 0x11d   :  { %v2394_v49 = vpop.eup %2393 }
 0x11e   :  { %v2396_v12 = vpop.eup %2395  ;;  %v1479_v31 = vxor.u32 2147483648, %v2394_v49  ;;  %v1349_v45 = vshrl.u32 %v1331_v63, %v1347_v8  ;;  %v1352_v1 = vadd.s32 127, %v1351_v44 }
 0x11f   :  { %v1476_v18 = vxor.u32 2147483648, %v2396_v12 }
 0x120   :  { %v1480_v30 = vsel %vm1478_vm3, %v1479_v31, %v2396_v12  ;;  %v1686_v54 = vsel %vm1684_vm4, %v1479_v31, %v2396_v12  ;;  %v1350_v21 = vor.u32 %v1349_v45, %v1348_v42  ;;  %v1353_v15 = vshll.u32 %v1352_v1, 23  ;;  %v2132_v42 = vpop.permute.xlu0 %2131 }
 0x121   :  { %v1477_v29 = vsel %vm1475_vm2, %v2394_v49, %v1476_v18  ;;  %v1683_v24 = vsel %vm1681_vm0, %v2394_v49, %v1476_v18  ;;  %vm1577_vm0 = vcmp.lt.s32.totalorder %v1576_v36, 2  ;;  %vm2177_vm2 = vcmask 130048  }
 0x122   :  { %v1481_v59 = vsel %vm1474_vm7, %v1477_v29, %v1480_v30  ;;  %v1687_v17 = vsel %vm1680_vm8, %v1683_v24, %v1686_v54  ;;  %v1354_v3 = vor.u32 4788187, %v1353_v15  ;;  %v1357_v26 = vcvt.s32.f32 %v1350_v21  ;;  %v2404_v30 = vld [vmem:[#allocation2] sm:$0xff] }
 0x123   :  { %v1482_v5 = vsel %vm1471_vm5, nan, %v1481_v59  ;;  %v3404_v27 = vsel %vm1471_vm5, nan, %v1687_v17  ;;  %v2179_v16 = vsel %vm2177_vm2, %v2403_v39, %v2110_v33  ;;  %vm2183_vm3 = vcmask 392192  }
 0x124   :  { %2157 = vrot.lane.b32.xlu1 %v1482_v5, %s2464_s18  ;;  %v1355_v53 = vand.u32 2147483647, %v1354_v3  ;;  %vm2180_vm4 = vcmask 261120   ;;  %vm2186_vm5 = vcmask 523264   ;;  %vm2192_vm7 = vcmask 785408  }
 0x125   :  { %v2182_v43 = vsel %vm2180_vm4, %v2179_v16, %v2118_v10  ;;  %vm2195_vm8 = vcmask 916480   ;;  %v2178_v54 = vsel %vm2177_vm2, %v2404_v30, %v2108_v56 }
 0x126   :  { %v1358_v47 = vmul.f32 %v1357_v26, %v1355_v53  ;;  %v2185_v60 = vsel %vm2183_vm3, %v2182_v43, %v2126_v9  ;;  %v2181_v1 = vsel %vm2180_vm4, %v2178_v54, %v2116_v32 }
 0x127   :  { %v2184_v29 = vsel %vm2183_vm3, %v2181_v1, %v2124_v41 }
 0x128   :  { %2173 = vrot.lane.b32.xlu1 %v2104_v52, %s2458_s0  ;;  %v1359_v40 = vxor.u32 2147483648, %v1358_v47  ;;  %v2187_v24 = vsel %vm2186_vm5, %v2184_v29, %v2132_v42 }
 0x12a   :  { %v1360_v34 = vsel %vm1277_vm9, %v1359_v40, %v1358_v47 }
 0x12b   :  { %v1363_v51 = vsel %vm1276_vm10, %v3250_v13, %v1360_v34  ;;  %v2134_v13 = vpop.permute.xlu1 %2133 }
 0x12c   :  { %2397 = vcosq.f32 %v1363_v51  ;;  %v2188_v2 = vsel %vm2186_vm5, %v2185_v60, %v2134_v13 }
 0x12d   :  { %2399 = vsinq.f32 %v1363_v51 }
 0x133   :  { %v2142_v22 = vpop.permute.xlu1 %2141 }
 0x134   :  { %v2191_v6 = vsel %vm2189_vm13, %v2188_v2, %v2142_v22 }
 0x137   :  { %v2150_v62 = vpop.permute.xlu1 %2149 }
 0x138   :  { %v2194_v63 = vsel %vm2192_vm7, %v2191_v6, %v2150_v62 }
 0x139   :  { %v2398_v55 = vpop.eup %2397 }
 0x13a   :  { %v2400_v4 = vpop.eup %2399  ;;  %v1375_v23 = vxor.u32 2147483648, %v2398_v55 }
 0x13b   :  { %v1372_v11 = vxor.u32 2147483648, %v2400_v4 }
 0x13c   :  { %v1376_v57 = vsel %vm1374_vm6, %v1375_v23, %v2400_v4  ;;  %v1583_v35 = vsel %vm1581_vm11, %v1375_v23, %v2400_v4 }
 0x13d   :  { %v1373_v48 = vsel %vm1371_vm12, %v2398_v55, %v1372_v11  ;;  %v1580_v58 = vsel %vm1578_vm14, %v2398_v55, %v1372_v11 }
 0x13e   :  { %v1377_v20 = vsel %vm1370_vm15, %v1373_v48, %v1376_v57  ;;  %v1584_v37 = vsel %vm1577_vm0, %v1580_v58, %v1583_v35 }
 0x13f   :  { %v1378_v0 = vsel %vm1367_vm1, nan, %v1377_v20  ;;  %v1585_v38 = vsel %vm1367_vm1, nan, %v1584_v37 }
 0x140   :  { %2155 = vrot.lane.b32.xlu0 %v1378_v0, %s2464_s18 }
 0x144   :  { %2171 = vrot.lane.b32.xlu0 %v2001_v28, %s2458_s0 }
 0x14a   :  { %v2140_v44 = vpop.permute.xlu0 %2139 }
 0x14b   :  { %v2190_v59 = vsel %vm2189_vm13, %v2187_v24, %v2140_v44 }
 0x14e   :  { %v2148_v18 = vpop.permute.xlu0 %2147 }
 0x14f   :  { %v2193_v17 = vsel %vm2192_vm7, %v2190_v59, %v2148_v18 }
 0x168   :  { %v2166_v46 = vpop.permute.xlu1 %2165 }
 0x169   :  { %v2199_v12 = vsel %vm2177_vm2, %v3404_v27, %v2166_v46 }
 0x181   :  { %v2164_v45 = vpop.permute.xlu0 %2163 }
 0x182   :  { %v2198_v5 = vsel %vm2177_vm2, %v1585_v38, %v2164_v45 }
 0x196   :  { %v2158_v49 = vpop.permute.xlu1 %2157 }
 0x197   :  { %v2197_v25 = vsel %vm2195_vm8, %v2194_v63, %v2158_v49 }
 0x198   :  { %2204 = vst [vmem:[#allocation5 + $0x10] sm:$0xff] %v2197_v25 }
 0x19a   :  { %v2174_v31 = vpop.permute.xlu1 %2173 }
 0x19b   :  { %v2201_v8 = vsel %vm2180_vm4, %v2199_v12, %v2174_v31 }
 0x19c   :  { %2205 = vst.msk [vmem:[#allocation5 + $0x18] sm:$0xff] %vm2183_vm3, %v2201_v8 }
 0x1b2   :  { %v2156_v21 = vpop.permute.xlu0 %2155 }
 0x1b3   :  { %v2196_v15 = vsel %vm2195_vm8, %v2193_v17, %v2156_v21 }
 0x1b4   :  { %2202 = vst [vmem:[#allocation5] sm:$0xff] %v2196_v15 }
 0x1b6   :  { %v2172_v27 = vpop.permute.xlu0 %2171 }
 0x1b7   :  { %v2200_v3 = vsel %vm2180_vm4, %v2198_v5, %v2172_v27 }
 0x1b8   :  { %2203 = vst.msk [vmem:[#allocation5 + $0x8] sm:$0xff] %vm2183_vm3, %v2200_v3 }
 0x1b9   :  { %2436 = shalt.err (!%p2433_p9)
}
 0x1ba   :  { %s2466_s22 = smov 256  }
 0x1bb   :  { %2217 = dma.vmem_to_hbm [thread:$0]  %s2212_s20, 512, %s3447_s1, [#allocation4], %s2466_s22, %s2466_s22, %s2459_s13  }
 0x1bc   :  { %2447 = dma.done.wait [#allocation4], 512  }
 0x1bd   :  { %2448 = vsyncadd [#allocation4], 4294966784 }
 0x1be   :  { %2221 = vsyncpa [#allocation3], 1 }
 0x1bf   :  { %2222 = vsyncpa [#allocation4], 1 }

</bundles_post_ra>
